<compile_context>
chip_gen: v5e
topology: v5e:2x2
jax: 0.10.0
libtpu: 0.0.40
codegen_flags: <defaults>
</compile_context>

<pallas_src>
import functools

import jax
import jax.numpy as jnp
from jax.experimental import pallas as pl
from jax.experimental.pallas import tpu as pltpu


def _round_up(v, m):
    return (v + m - 1) // m * m


def _fused_gcn_kernel(at_ref, xt_ref,
                      wrel1_ref, wroot1_ref, brel1_ref,
                      wrel2_ref, wroot2_ref, brel2_ref,
                      w1_ref, b1_ref, w2_ref, b2_ref,
                      w3_ref, b3_ref, w4_ref, b4_ref,
                      o_ref,
                      ht_ref, out_t_ref, x2_ref,
                      *, batch_size, nn_pad, tk):
    """grid = (phase, dst-tile).  phase 0: conv1, phase 1: conv2.
    MLP head + log_softmax run once on the final grid step."""
    phase = pl.program_id(0)
    j = pl.program_id(1)
    jj = pl.multiple_of(j * tk, tk)            # lane offset of this destination tile

    @pl.when(phase == 0)
    def _conv1():
        # h^T[:, tile] = relu( (wrel1^T * x^T) @ A^T[:, tile] + wroot1^T * x^T[tile] + brel1^T )
        xt = xt_ref[...]                                              # (1, Np)  f32
        s1 = (wrel1_ref[...] * xt).astype(at_ref.dtype)               # (H4, Np) bf16
        agg = jnp.dot(s1, at_ref[...],
                      preferred_element_type=jnp.float32)             # (H4, tk) f32
        xt_j = xt_ref[:, pl.ds(jj, tk)]                               # (1, tk)
        h_j = agg + wroot1_ref[...] * xt_j + brel1_ref[...]
        ht_ref[:, pl.ds(jj, tk)] = jnp.maximum(h_j, 0.0)              # .relu()

    @pl.when(phase == 1)
    def _conv2():
        # out^T[:, tile] = sum_k( (h^T @ A^T[:, tile]) * wrel2 + h^T[:, tile] * wroot2 ) + brel2
        ht = ht_ref[...]                                              # (H4, Np) f32
        agg = jnp.dot(ht.astype(at_ref.dtype), at_ref[...],
                      preferred_element_type=jnp.float32)             # (H4, tk) f32
        h_j = ht_ref[:, pl.ds(jj, tk)]                                # (H4, tk)
        out_j = (jnp.sum(agg * wrel2_ref[...] + h_j * wroot2_ref[...],
                         axis=0, keepdims=True)
                 + brel2_ref[...])                                    # (1, tk)  lane-dense
        out_t_ref[:, pl.ds(jj, tk)] = out_j

    last = ((phase == pl.num_programs(0) - 1)
            & (j == pl.num_programs(1) - 1))

    @pl.when(last)
    def _mlp_head():
        # x.view(batch_size, N // batch_size): each graph owns a lane-aligned
        # nn_pad-wide block of the conv output; copy row-by-row (static, aligned
        # slices).  Padded lanes meet the zero-padded rows of w1 -> contribute 0.
        for b in range(batch_size):                                   # static unroll
            x2_ref[pl.ds(b, 1), :] = out_t_ref[:, b * nn_pad:(b + 1) * nn_pad]
        x2 = x2_ref[...]                                              # (B, nn_pad)

        y = jnp.maximum(jnp.dot(x2, w1_ref[...],
                                preferred_element_type=jnp.float32) + b1_ref[...], 0.0)
        # F.dropout(p=0.5, training=False) == identity in eval mode.
        y = jnp.maximum(jnp.dot(y, w2_ref[...],
                                preferred_element_type=jnp.float32) + b2_ref[...], 0.0)
        y = jnp.maximum(jnp.dot(y, w3_ref[...],
                                preferred_element_type=jnp.float32) + b3_ref[...], 0.0)
        y = jnp.dot(y, w4_ref[...],
                    preferred_element_type=jnp.float32) + b4_ref[...]

        # log_softmax over dim=1 (numerically stable)
        m = jnp.max(y, axis=1, keepdims=True)
        lse = jnp.log(jnp.sum(jnp.exp(y - m), axis=1, keepdims=True))
        o_ref[...] = y - m - lse


def _resident_spec(arr):
    """Whole array resident in VMEM (constant block index -> fetched once)."""
    zeros = (0,) * arr.ndim
    return pl.BlockSpec(arr.shape, lambda p, j, _z=zeros: _z)


@functools.partial(jax.jit, static_argnames=("batch_size",))
def gcn_forward(x, edge_index, edge_weight, batch, params, *, batch_size):
    """x: (N, 1) f32; edge_index: (2, E) i32; edge_weight: (E,) f32;
    batch: (N,) i32 graph ids (nodes contiguous & sorted per graph, same
    assumption the original .view() makes).  batch_size is static (the module's
    len(torch.unique(batch))) so there is no host sync and the forward jits."""
    N = x.shape[0]
    nn = N // batch_size                        # nodes per graph == lin1 in-features
    h4 = params["wrel1"].shape[1]
    out_ch = params["w4"].shape[1]

    nn_pad = _round_up(nn, 128)                 # lane-align each graph's node block
    np_tot = batch_size * nn_pad

    # destination-tile width: largest aligned tile that divides the padded node count
    tk = 128
    for cand in (1024, 512, 256):
        if np_tot % cand == 0:
            tk = cand
            break

    # --- host glue -----------------------------------------------------------
    # Relabel node i -> batch[i]*nn_pad + (i - batch[i]*nn) so each graph occupies a
    # lane-aligned block, then densify the weighted adjacency.  A^T is built
    # directly (AT[src, dst] += w) because the transposed, lane-dense kernel
    # contracts against A^T.
    # TODO(synk): for E << N^2 replace the dense A^T with an edge-list segment-sum
    # Pallas kernel (scalar-prefetched src/dst); the dense SpMM path is O(N^2)
    # bandwidth and only sensible for small graphs.
    src, dst = edge_index[0], edge_index[1]
    local = jnp.arange(N, dtype=jnp.int32) - batch.astype(jnp.int32) * nn
    pid = batch.astype(jnp.int32) * nn_pad + local
    xt_p = jnp.zeros((1, np_tot), jnp.float32).at[0, pid].set(x[:, 0])
    at_p = (jnp.zeros((np_tot, np_tot), jnp.float32)
            .at[pid[src], pid[dst]].add(edge_weight)
            .astype(jnp.bfloat16))              # bf16 MXU operand, f32 accumulation

    # lin1 weight padded with zero rows so padded lanes contribute nothing
    w1p = (jnp.zeros((nn_pad, params["w1"].shape[1]), jnp.float32)
           .at[:nn, :].set(params["w1"]))

    operands = (
        at_p, xt_p,
        params["wrel1"].T, params["wroot1"].T, params["brel1"].T,    # (H4, 1) columns
        params["wrel2"], params["wroot2"], params["brel2"],          # (H4,1),(H4,1),(1,1)
        w1p, params["b1"], params["w2"], params["b2"],
        params["w3"], params["b3"], params["w4"], params["b4"],
    )

    kernel = functools.partial(_fused_gcn_kernel, batch_size=batch_size,
                               nn_pad=nn_pad, tk=tk)

    in_specs = [pl.BlockSpec((np_tot, tk), lambda p, j: (0, j))]      # stream A^T dst tiles
    in_specs += [_resident_spec(a) for a in operands[1:]]             # x^T + weights resident

    return pl.pallas_call(
        kernel,
        out_shape=jax.ShapeDtypeStruct((batch_size, out_ch), jnp.float32),
        grid_spec=pltpu.PrefetchScalarGridSpec(
            num_scalar_prefetch=0,
            grid=(2, np_tot // tk),             # (phase, destination tile)
            in_specs=in_specs,
            out_specs=pl.BlockSpec((batch_size, out_ch), lambda p, j: (0, 0)),
            scratch_shapes=[
                pltpu.VMEM((h4, np_tot), jnp.float32),          # h^T
                pltpu.VMEM((1, np_tot), jnp.float32),           # conv output (lane dense)
                pltpu.VMEM((batch_size, nn_pad), jnp.float32),  # x.view(B, N//B)
            ],
        ),
        # Phase 1 consumes every phase-0 tile through the VMEM scratch, so neither
        # grid axis may be partitioned across cores.
        compiler_params=pltpu.CompilerParams(
            dimension_semantics=("arbitrary", "arbitrary")),
    )(*operands)


def gcn_reference(x, edge_index, edge_weight, batch, params, batch_size):
    """Pure-JAX f32 reference of the PyTorch module (eval mode)."""
    N = x.shape[0]
    src, dst = edge_index[0], edge_index[1]
    A = jnp.zeros((N, N), jnp.float32).at[dst, src].add(edge_weight)
    h = jnp.maximum((A @ x) @ params["wrel1"] + x @ params["wroot1"]
                    + params["brel1"], 0.0)
    out = (A @ h) @ params["wrel2"] + h @ params["wroot2"] + params["brel2"]
    x2 = out.reshape(batch_size, N // batch_size)
    y = jnp.maximum(x2 @ params["w1"] + params["b1"], 0.0)
    y = jnp.maximum(y @ params["w2"] + params["b2"], 0.0)
    y = jnp.maximum(y @ params["w3"] + params["b3"], 0.0)
    y = y @ params["w4"] + params["b4"]
    return jax.nn.log_softmax(y, axis=1)


def init_params(key, input_channels, output_channels, hidden_channels, num_nodes):
    assert input_channels == 1, "the module's .view() implies input_channels == 1"
    h4 = hidden_channels // 4
    dims = dict(
        wrel1=(input_channels, h4), wroot1=(input_channels, h4), brel1=(1, h4),
        wrel2=(h4, input_channels), wroot2=(h4, input_channels), brel2=(1, input_channels),
        w1=(num_nodes, num_nodes // 5), b1=(1, num_nodes // 5),
        w2=(num_nodes // 5, num_nodes // 25), b2=(1, num_nodes // 25),
        w3=(num_nodes // 25, num_nodes // 125), b3=(1, num_nodes // 125),
        w4=(num_nodes // 125, output_channels), b4=(1, output_channels),
    )
    params = {}
    for name, shape in dims.items():
        key, sub = jax.random.split(key)
        scale = 0.1 if name.startswith("w") else 0.01
        params[name] = scale * jax.random.normal(sub, shape, jnp.float32)
    return params


if __name__ == "__main__":
    # Small shapes consistent with the module's forward:
    input_channels = 1          # forced by x.view(batch_size, N // batch_size)
    hidden_channels = 32        # conv hidden = 32 // 4 = 8
    output_channels = 4
    nodes_per_graph = 250       # num_nodes (lin1 in-features); //5=50, //25=10, //125=2
    num_graphs = 2
    N = num_graphs * nodes_per_graph

    key = jax.random.PRNGKey(0)
    k_x, k_w, k_p = jax.random.split(key, 3)

    # Node features
    x = jax.random.normal(k_x, (N, input_channels), jnp.float32)

    # Ring edges (both directions) inside each graph
    idx = jnp.arange(nodes_per_graph)
    srcs, dsts = [], []
    for g in range(num_graphs):
        base = g * nodes_per_graph
        s = base + idx
        d = base + (idx + 1) % nodes_per_graph
        srcs += [s, d]
        dsts += [d, s]
    edge_index = jnp.stack([jnp.concatenate(srcs),
                            jnp.concatenate(dsts)]).astype(jnp.int32)
    edge_weight = jax.random.uniform(k_w, (edge_index.shape[1],), jnp.float32)
    batch = jnp.repeat(jnp.arange(num_graphs, dtype=jnp.int32), nodes_per_graph)

    params = init_params(k_p, input_channels, output_channels, hidden_channels,
                         nodes_per_graph)

    out = gcn_forward(x, edge_index, edge_weight, batch, params,
                      batch_size=num_graphs)
    out = jax.block_until_ready(out)

    ref = gcn_reference(x, edge_index, edge_weight, batch, params, num_graphs)

    assert out.shape == (num_graphs, output_channels)
    assert bool(jnp.all(jnp.isfinite(out)))
    # rows of log_softmax must exp-sum to 1
    assert bool(jnp.allclose(jnp.sum(jnp.exp(out), axis=1), 1.0, atol=1e-5))
    # bf16 adjacency operand (f32 accumulation) -> loose but meaningful tolerance
    assert bool(jnp.allclose(out, ref, atol=5e-2, rtol=5e-2))
    print("KERNEL_OK")
</pallas_src>

<mosaic_0001>
module attributes {stable_mosaic.version = 11 : i64} {
  func.func @_fused_gcn_kernel(%arg0: i32, %arg1: i32, %arg2: memref<512x512xbf16, #tpu.memory_space<vmem>>, %arg3: memref<1x512xf32, #tpu.memory_space<vmem>>, %arg4: memref<8x1xf32, #tpu.memory_space<vmem>>, %arg5: memref<8x1xf32, #tpu.memory_space<vmem>>, %arg6: memref<8x1xf32, #tpu.memory_space<vmem>>, %arg7: memref<8x1xf32, #tpu.memory_space<vmem>>, %arg8: memref<8x1xf32, #tpu.memory_space<vmem>>, %arg9: memref<1x1xf32, #tpu.memory_space<vmem>>, %arg10: memref<256x50xf32, #tpu.memory_space<vmem>>, %arg11: memref<1x50xf32, #tpu.memory_space<vmem>>, %arg12: memref<50x10xf32, #tpu.memory_space<vmem>>, %arg13: memref<1x10xf32, #tpu.memory_space<vmem>>, %arg14: memref<10x2xf32, #tpu.memory_space<vmem>>, %arg15: memref<1x2xf32, #tpu.memory_space<vmem>>, %arg16: memref<2x4xf32, #tpu.memory_space<vmem>>, %arg17: memref<1x4xf32, #tpu.memory_space<vmem>>, %arg18: memref<2x4xf32, #tpu.memory_space<vmem>>, %arg19: memref<8x512xf32, #tpu.memory_space<vmem>>, %arg20: memref<1x512xf32, #tpu.memory_space<vmem>>, %arg21: memref<2x256xf32, #tpu.memory_space<vmem>>) attributes {dimension_semantics = [#tpu.dimension_semantics<arbitrary>, #tpu.dimension_semantics<arbitrary>], iteration_bounds = array<i64: 2, 1>, scalar_prefetch = 0 : i64, scratch_operands = 3 : i64, tpu.core_type = #tpu.core_type<tc>, window_params = [{transform_indices = @transform_0, window_bounds = array<i64: 512, 512>}, {pipeline_mode = #tpu.pipeline_mode<synchronous>, transform_indices = @transform_1, window_bounds = array<i64: 1, 512>}, {pipeline_mode = #tpu.pipeline_mode<synchronous>, transform_indices = @transform_2, window_bounds = array<i64: 8, 1>}, {pipeline_mode = #tpu.pipeline_mode<synchronous>, transform_indices = @transform_3, window_bounds = array<i64: 8, 1>}, {pipeline_mode = #tpu.pipeline_mode<synchronous>, transform_indices = @transform_4, window_bounds = array<i64: 8, 1>}, {pipeline_mode = #tpu.pipeline_mode<synchronous>, transform_indices = @transform_5, window_bounds = array<i64: 8, 1>}, {pipeline_mode = #tpu.pipeline_mode<synchronous>, transform_indices = @transform_6, window_bounds = array<i64: 8, 1>}, {pipeline_mode = #tpu.pipeline_mode<synchronous>, transform_indices = @transform_7, window_bounds = array<i64: 1, 1>}, {pipeline_mode = #tpu.pipeline_mode<synchronous>, transform_indices = @transform_8, window_bounds = array<i64: 256, 50>}, {pipeline_mode = #tpu.pipeline_mode<synchronous>, transform_indices = @transform_9, window_bounds = array<i64: 1, 50>}, {pipeline_mode = #tpu.pipeline_mode<synchronous>, transform_indices = @transform_10, window_bounds = array<i64: 50, 10>}, {pipeline_mode = #tpu.pipeline_mode<synchronous>, transform_indices = @transform_11, window_bounds = array<i64: 1, 10>}, {pipeline_mode = #tpu.pipeline_mode<synchronous>, transform_indices = @transform_12, window_bounds = array<i64: 10, 2>}, {pipeline_mode = #tpu.pipeline_mode<synchronous>, transform_indices = @transform_13, window_bounds = array<i64: 1, 2>}, {pipeline_mode = #tpu.pipeline_mode<synchronous>, transform_indices = @transform_14, window_bounds = array<i64: 2, 4>}, {pipeline_mode = #tpu.pipeline_mode<synchronous>, transform_indices = @transform_15, window_bounds = array<i64: 1, 4>}, {pipeline_mode = #tpu.pipeline_mode<synchronous>, transform_indices = @transform_16, window_bounds = array<i64: 2, 4>}]} {
    %c512_i32 = arith.constant 512 : i32
    %0 = arith.muli %arg1, %c512_i32 : i32
    %1 = tpu.assume_multiple %0, 512 : i32
    %c0_i32 = arith.constant 0 : i32
    %2 = arith.cmpi eq, %arg0, %c0_i32 : i32
    %3 = arith.extui %2 : i1 to i32
    %c0_i32_0 = arith.constant 0 : i32
    %4 = arith.cmpi ne, %3, %c0_i32_0 : i32
    scf.if %4 {
      %c0 = arith.constant 0 : index
      %c0_5 = arith.constant 0 : index
      %13 = vector.load %arg3[%c0, %c0_5] : memref<1x512xf32, #tpu.memory_space<vmem>>, vector<1x512xf32>
      %c0_6 = arith.constant 0 : index
      %c0_7 = arith.constant 0 : index
      %14 = vector.load %arg4[%c0_6, %c0_7] : memref<8x1xf32, #tpu.memory_space<vmem>>, vector<8x1xf32>
      %15 = vector.broadcast %14 : vector<8x1xf32> to vector<8x512xf32>
      %16 = vector.broadcast %13 : vector<1x512xf32> to vector<8x512xf32>
      %17 = arith.mulf %15, %16 : vector<8x512xf32>
      %18 = arith.truncf %17 : vector<8x512xf32> to vector<8x512xbf16>
      %c0_8 = arith.constant 0 : index
      %c0_9 = arith.constant 0 : index
      %19 = vector.load %arg2[%c0_8, %c0_9] : memref<512x512xbf16, #tpu.memory_space<vmem>>, vector<512x512xbf16>
      %cst = arith.constant dense<0.000000e+00> : vector<8x512xf32>
      %20 = tpu.matmul %18, %19, %cst {dimension_numbers = #tpu.dot_dimension_numbers<[1], [0], [0], [1], [0, 0, 1, 1], [], []>} : vector<8x512xbf16>, vector<512x512xbf16>, vector<8x512xf32> -> vector<8x512xf32>
      %c0_10 = arith.constant 0 : index
      %21 = arith.index_cast %1 : i32 to index
      %22 = vector.load %arg3[%c0_10, %21] : memref<1x512xf32, #tpu.memory_space<vmem>>, vector<1x512xf32>
      %c0_11 = arith.constant 0 : index
      %c0_12 = arith.constant 0 : index
      %23 = vector.load %arg5[%c0_11, %c0_12] : memref<8x1xf32, #tpu.memory_space<vmem>>, vector<8x1xf32>
      %24 = vector.broadcast %23 : vector<8x1xf32> to vector<8x512xf32>
      %25 = vector.broadcast %22 : vector<1x512xf32> to vector<8x512xf32>
      %26 = arith.mulf %24, %25 : vector<8x512xf32>
      %27 = arith.addf %20, %26 : vector<8x512xf32>
      %c0_13 = arith.constant 0 : index
      %c0_14 = arith.constant 0 : index
      %28 = vector.load %arg6[%c0_13, %c0_14] : memref<8x1xf32, #tpu.memory_space<vmem>>, vector<8x1xf32>
      %29 = vector.broadcast %28 : vector<8x1xf32> to vector<8x512xf32>
      %30 = arith.addf %27, %29 : vector<8x512xf32>
      %cst_15 = arith.constant 0.000000e+00 : f32
      %31 = vector.broadcast %cst_15 : f32 to vector<8x512xf32>
      %32 = arith.maximumf %30, %31 : vector<8x512xf32>
      %c0_16 = arith.constant 0 : index
      %33 = arith.index_cast %1 : i32 to index
      %34 = vector.load %arg19[%c0_16, %33] : memref<8x512xf32, #tpu.memory_space<vmem>>, vector<8x512xf32>
      tpu.vector_store %arg19[%c0_16, %33], %32 {strides = array<i32>} : memref<8x512xf32, #tpu.memory_space<vmem>>, vector<8x512xf32>,
    } else {
    }
    %c1_i32 = arith.constant 1 : i32
    %5 = arith.cmpi eq, %arg0, %c1_i32 : i32
    %6 = arith.extui %5 : i1 to i32
    %c0_i32_1 = arith.constant 0 : i32
    %7 = arith.cmpi ne, %6, %c0_i32_1 : i32
    scf.if %7 {
      %c0 = arith.constant 0 : index
      %c0_5 = arith.constant 0 : index
      %13 = vector.load %arg19[%c0, %c0_5] : memref<8x512xf32, #tpu.memory_space<vmem>>, vector<8x512xf32>
      %14 = arith.truncf %13 : vector<8x512xf32> to vector<8x512xbf16>
      %c0_6 = arith.constant 0 : index
      %c0_7 = arith.constant 0 : index
      %15 = vector.load %arg2[%c0_6, %c0_7] : memref<512x512xbf16, #tpu.memory_space<vmem>>, vector<512x512xbf16>
      %cst = arith.constant dense<0.000000e+00> : vector<8x512xf32>
      %16 = tpu.matmul %14, %15, %cst {dimension_numbers = #tpu.dot_dimension_numbers<[1], [0], [0], [1], [0, 0, 1, 1], [], []>} : vector<8x512xbf16>, vector<512x512xbf16>, vector<8x512xf32> -> vector<8x512xf32>
      %c0_8 = arith.constant 0 : index
      %17 = arith.index_cast %1 : i32 to index
      %18 = vector.load %arg19[%c0_8, %17] : memref<8x512xf32, #tpu.memory_space<vmem>>, vector<8x512xf32>
      %c0_9 = arith.constant 0 : index
      %c0_10 = arith.constant 0 : index
      %19 = vector.load %arg7[%c0_9, %c0_10] : memref<8x1xf32, #tpu.memory_space<vmem>>, vector<8x1xf32>
      %20 = vector.broadcast %19 : vector<8x1xf32> to vector<8x512xf32>
      %21 = arith.mulf %16, %20 : vector<8x512xf32>
      %c0_11 = arith.constant 0 : index
      %c0_12 = arith.constant 0 : index
      %22 = vector.load %arg8[%c0_11, %c0_12] : memref<8x1xf32, #tpu.memory_space<vmem>>, vector<8x1xf32>
      %23 = vector.broadcast %22 : vector<8x1xf32> to vector<8x512xf32>
      %24 = arith.mulf %18, %23 : vector<8x512xf32>
      %25 = arith.addf %21, %24 : vector<8x512xf32>
      %cst_13 = arith.constant dense<0.000000e+00> : vector<512xf32>
      %26 = vector.multi_reduction <add>, %25, %cst_13 [0] : vector<8x512xf32> to vector<512xf32>
      %27 = vector.shape_cast %26 : vector<512xf32> to vector<1x512xf32>
      %c0_14 = arith.constant 0 : index
      %c0_15 = arith.constant 0 : index
      %28 = vector.load %arg9[%c0_14, %c0_15] : memref<1x1xf32, #tpu.memory_space<vmem>>, vector<1x1xf32>
      %29 = vector.broadcast %28 : vector<1x1xf32> to vector<1x512xf32>
      %30 = arith.addf %27, %29 : vector<1x512xf32>
      %c0_16 = arith.constant 0 : index
      %31 = arith.index_cast %1 : i32 to index
      %32 = vector.load %arg20[%c0_16, %31] : memref<1x512xf32, #tpu.memory_space<vmem>>, vector<1x512xf32>
      tpu.vector_store %arg20[%c0_16, %31], %30 {strides = array<i32>} : memref<1x512xf32, #tpu.memory_space<vmem>>, vector<1x512xf32>,
    } else {
    }
    %c1_i32_2 = arith.constant 1 : i32
    %8 = arith.cmpi eq, %arg0, %c1_i32_2 : i32
    %c0_i32_3 = arith.constant 0 : i32
    %9 = arith.cmpi eq, %arg1, %c0_i32_3 : i32
    %10 = arith.andi %8, %9 : i1
    %11 = arith.extui %10 : i1 to i32
    %c0_i32_4 = arith.constant 0 : i32
    %12 = arith.cmpi ne, %11, %c0_i32_4 : i32
    scf.if %12 {
      %c0 = arith.constant 0 : index
      %c0_5 = arith.constant 0 : index
      %13 = vector.load %arg20[%c0, %c0_5] : memref<1x512xf32, #tpu.memory_space<vmem>>, vector<1x256xf32>
      %c0_6 = arith.constant 0 : index
      %c0_7 = arith.constant 0 : index
      %14 = vector.load %arg21[%c0_6, %c0_7] : memref<2x256xf32, #tpu.memory_space<vmem>>, vector<1x256xf32>
      tpu.vector_store %arg21[%c0_6, %c0_7], %13 {strides = array<i32>} : memref<2x256xf32, #tpu.memory_space<vmem>>, vector<1x256xf32>,
      %c0_8 = arith.constant 0 : index
      %c256 = arith.constant 256 : index
      %15 = vector.load %arg20[%c0_8, %c256] : memref<1x512xf32, #tpu.memory_space<vmem>>, vector<1x256xf32>
      %c1 = arith.constant 1 : index
      %c0_9 = arith.constant 0 : index
      %16 = vector.load %arg21[%c1, %c0_9] : memref<2x256xf32, #tpu.memory_space<vmem>>, vector<1x256xf32>
      tpu.vector_store %arg21[%c1, %c0_9], %15 {strides = array<i32>} : memref<2x256xf32, #tpu.memory_space<vmem>>, vector<1x256xf32>,
      %c0_10 = arith.constant 0 : index
      %c0_11 = arith.constant 0 : index
      %17 = vector.load %arg21[%c0_10, %c0_11] : memref<2x256xf32, #tpu.memory_space<vmem>>, vector<2x256xf32>
      %c0_12 = arith.constant 0 : index
      %c0_13 = arith.constant 0 : index
      %18 = vector.load %arg10[%c0_12, %c0_13] : memref<256x50xf32, #tpu.memory_space<vmem>>, vector<256x50xf32>
      %cst = arith.constant dense<0.000000e+00> : vector<2x50xf32>
      %19 = tpu.matmul %17, %18, %cst {dimension_numbers = #tpu.dot_dimension_numbers<[1], [0], [0], [1], [0, 0, 1, 1], [], []>} : vector<2x256xf32>, vector<256x50xf32>, vector<2x50xf32> -> vector<2x50xf32>
      %c0_14 = arith.constant 0 : index
      %c0_15 = arith.constant 0 : index
      %20 = vector.load %arg11[%c0_14, %c0_15] : memref<1x50xf32, #tpu.memory_space<vmem>>, vector<1x50xf32>
      %21 = vector.broadcast %20 : vector<1x50xf32> to vector<2x50xf32>
      %22 = arith.addf %19, %21 : vector<2x50xf32>
      %cst_16 = arith.constant 0.000000e+00 : f32
      %23 = vector.broadcast %cst_16 : f32 to vector<2x50xf32>
      %24 = arith.maximumf %22, %23 : vector<2x50xf32>
      %c0_17 = arith.constant 0 : index
      %c0_18 = arith.constant 0 : index
      %25 = vector.load %arg12[%c0_17, %c0_18] : memref<50x10xf32, #tpu.memory_space<vmem>>, vector<50x10xf32>
      %cst_19 = arith.constant dense<0.000000e+00> : vector<2x10xf32>
      %26 = tpu.matmul %24, %25, %cst_19 {dimension_numbers = #tpu.dot_dimension_numbers<[1], [0], [0], [1], [0, 0, 1, 1], [], []>} : vector<2x50xf32>, vector<50x10xf32>, vector<2x10xf32> -> vector<2x10xf32>
      %c0_20 = arith.constant 0 : index
      %c0_21 = arith.constant 0 : index
      %27 = vector.load %arg13[%c0_20, %c0_21] : memref<1x10xf32, #tpu.memory_space<vmem>>, vector<1x10xf32>
      %28 = vector.broadcast %27 : vector<1x10xf32> to vector<2x10xf32>
      %29 = arith.addf %26, %28 : vector<2x10xf32>
      %cst_22 = arith.constant 0.000000e+00 : f32
      %30 = vector.broadcast %cst_22 : f32 to vector<2x10xf32>
      %31 = arith.maximumf %29, %30 : vector<2x10xf32>
      %c0_23 = arith.constant 0 : index
      %c0_24 = arith.constant 0 : index
      %32 = vector.load %arg14[%c0_23, %c0_24] : memref<10x2xf32, #tpu.memory_space<vmem>>, vector<10x2xf32>
      %cst_25 = arith.constant dense<0.000000e+00> : vector<2x2xf32>
      %33 = tpu.matmul %31, %32, %cst_25 {dimension_numbers = #tpu.dot_dimension_numbers<[1], [0], [0], [1], [0, 0, 1, 1], [], []>} : vector<2x10xf32>, vector<10x2xf32>, vector<2x2xf32> -> vector<2x2xf32>
      %c0_26 = arith.constant 0 : index
      %c0_27 = arith.constant 0 : index
      %34 = vector.load %arg15[%c0_26, %c0_27] : memref<1x2xf32, #tpu.memory_space<vmem>>, vector<1x2xf32>
      %35 = vector.broadcast %34 : vector<1x2xf32> to vector<2x2xf32>
      %36 = arith.addf %33, %35 : vector<2x2xf32>
      %cst_28 = arith.constant 0.000000e+00 : f32
      %37 = vector.broadcast %cst_28 : f32 to vector<2x2xf32>
      %38 = arith.maximumf %36, %37 : vector<2x2xf32>
      %c0_29 = arith.constant 0 : index
      %c0_30 = arith.constant 0 : index
      %39 = vector.load %arg16[%c0_29, %c0_30] : memref<2x4xf32, #tpu.memory_space<vmem>>, vector<2x4xf32>
      %cst_31 = arith.constant dense<0.000000e+00> : vector<2x4xf32>
      %40 = tpu.matmul %38, %39, %cst_31 {dimension_numbers = #tpu.dot_dimension_numbers<[1], [0], [0], [1], [0, 0, 1, 1], [], []>} : vector<2x2xf32>, vector<2x4xf32>, vector<2x4xf32> -> vector<2x4xf32>
      %c0_32 = arith.constant 0 : index
      %c0_33 = arith.constant 0 : index
      %41 = vector.load %arg17[%c0_32, %c0_33] : memref<1x4xf32, #tpu.memory_space<vmem>>, vector<1x4xf32>
      %42 = vector.broadcast %41 : vector<1x4xf32> to vector<2x4xf32>
      %43 = arith.addf %40, %42 : vector<2x4xf32>
      %cst_34 = arith.constant dense<0xFF800000> : vector<2xf32>
      %44 = vector.multi_reduction <maximumf>, %43, %cst_34 [1] : vector<2x4xf32> to vector<2xf32>
      %45 = vector.shape_cast %44 : vector<2xf32> to vector<2x1xf32>
      %46 = vector.broadcast %45 : vector<2x1xf32> to vector<2x4xf32>
      %47 = arith.subf %43, %46 : vector<2x4xf32>
      %48 = math.exp %47 : vector<2x4xf32>
      %cst_35 = arith.constant dense<0.000000e+00> : vector<2xf32>
      %49 = vector.multi_reduction <add>, %48, %cst_35 [1] : vector<2x4xf32> to vector<2xf32>
      %50 = vector.shape_cast %49 : vector<2xf32> to vector<2x1xf32>
      %51 = math.log %50 : vector<2x1xf32>
      %52 = vector.broadcast %45 : vector<2x1xf32> to vector<2x4xf32>
      %53 = arith.subf %43, %52 : vector<2x4xf32>
      %54 = vector.broadcast %51 : vector<2x1xf32> to vector<2x4xf32>
      %55 = arith.subf %53, %54 : vector<2x4xf32>
      %c0_36 = arith.constant 0 : index
      %c0_37 = arith.constant 0 : index
      %56 = vector.load %arg18[%c0_36, %c0_37] : memref<2x4xf32, #tpu.memory_space<vmem>>, vector<2x4xf32>
      tpu.vector_store %arg18[%c0_36, %c0_37], %55 {strides = array<i32>} : memref<2x4xf32, #tpu.memory_space<vmem>>, vector<2x4xf32>,
    } else {
    }
    return
  }
  func.func @transform_0(%arg0: i32, %arg1: i32) -> (i32, i32) {
    %c0_i32 = arith.constant 0 : i32
    %c0_i32_0 = arith.constant 0 : i32
    return %c0_i32, %arg1 : i32, i32
  }
  func.func @transform_1(%arg0: i32, %arg1: i32) -> (i32, i32) {
    %c0_i32 = arith.constant 0 : i32
    %c0_i32_0 = arith.constant 0 : i32
    %c0_i32_1 = arith.constant 0 : i32
    return %c0_i32, %c0_i32_0 : i32, i32
  }
  func.func @transform_2(%arg0: i32, %arg1: i32) -> (i32, i32) {
    %c0_i32 = arith.constant 0 : i32
    %c0_i32_0 = arith.constant 0 : i32
    %c0_i32_1 = arith.constant 0 : i32
    return %c0_i32, %c0_i32_0 : i32, i32
  }
  func.func @transform_3(%arg0: i32, %arg1: i32) -> (i32, i32) {
    %c0_i32 = arith.constant 0 : i32
    %c0_i32_0 = arith.constant 0 : i32
    %c0_i32_1 = arith.constant 0 : i32
    return %c0_i32, %c0_i32_0 : i32, i32
  }
  func.func @transform_4(%arg0: i32, %arg1: i32) -> (i32, i32) {
    %c0_i32 = arith.constant 0 : i32
    %c0_i32_0 = arith.constant 0 : i32
    %c0_i32_1 = arith.constant 0 : i32
    return %c0_i32, %c0_i32_0 : i32, i32
  }
  func.func @transform_5(%arg0: i32, %arg1: i32) -> (i32, i32) {
    %c0_i32 = arith.constant 0 : i32
    %c0_i32_0 = arith.constant 0 : i32
    %c0_i32_1 = arith.constant 0 : i32
    return %c0_i32, %c0_i32_0 : i32, i32
  }
  func.func @transform_6(%arg0: i32, %arg1: i32) -> (i32, i32) {
    %c0_i32 = arith.constant 0 : i32
    %c0_i32_0 = arith.constant 0 : i32
    %c0_i32_1 = arith.constant 0 : i32
    return %c0_i32, %c0_i32_0 : i32, i32
  }
  func.func @transform_7(%arg0: i32, %arg1: i32) -> (i32, i32) {
    %c0_i32 = arith.constant 0 : i32
    %c0_i32_0 = arith.constant 0 : i32
    %c0_i32_1 = arith.constant 0 : i32
    return %c0_i32, %c0_i32_0 : i32, i32
  }
  func.func @transform_8(%arg0: i32, %arg1: i32) -> (i32, i32) {
    %c0_i32 = arith.constant 0 : i32
    %c0_i32_0 = arith.constant 0 : i32
    %c0_i32_1 = arith.constant 0 : i32
    return %c0_i32, %c0_i32_0 : i32, i32
  }
  func.func @transform_9(%arg0: i32, %arg1: i32) -> (i32, i32) {
    %c0_i32 = arith.constant 0 : i32
    %c0_i32_0 = arith.constant 0 : i32
    %c0_i32_1 = arith.constant 0 : i32
    return %c0_i32, %c0_i32_0 : i32, i32
  }
  func.func @transform_10(%arg0: i32, %arg1: i32) -> (i32, i32) {
    %c0_i32 = arith.constant 0 : i32
    %c0_i32_0 = arith.constant 0 : i32
    %c0_i32_1 = arith.constant 0 : i32
    return %c0_i32, %c0_i32_0 : i32, i32
  }
  func.func @transform_11(%arg0: i32, %arg1: i32) -> (i32, i32) {
    %c0_i32 = arith.constant 0 : i32
    %c0_i32_0 = arith.constant 0 : i32
    %c0_i32_1 = arith.constant 0 : i32
    return %c0_i32, %c0_i32_0 : i32, i32
  }
  func.func @transform_12(%arg0: i32, %arg1: i32) -> (i32, i32) {
    %c0_i32 = arith.constant 0 : i32
    %c0_i32_0 = arith.constant 0 : i32
    %c0_i32_1 = arith.constant 0 : i32
    return %c0_i32, %c0_i32_0 : i32, i32
  }
  func.func @transform_13(%arg0: i32, %arg1: i32) -> (i32, i32) {
    %c0_i32 = arith.constant 0 : i32
    %c0_i32_0 = arith.constant 0 : i32
    %c0_i32_1 = arith.constant 0 : i32
    return %c0_i32, %c0_i32_0 : i32, i32
  }
  func.func @transform_14(%arg0: i32, %arg1: i32) -> (i32, i32) {
    %c0_i32 = arith.constant 0 : i32
    %c0_i32_0 = arith.constant 0 : i32
    %c0_i32_1 = arith.constant 0 : i32
    return %c0_i32, %c0_i32_0 : i32, i32
  }
  func.func @transform_15(%arg0: i32, %arg1: i32) -> (i32, i32) {
    %c0_i32 = arith.constant 0 : i32
    %c0_i32_0 = arith.constant 0 : i32
    %c0_i32_1 = arith.constant 0 : i32
    return %c0_i32, %c0_i32_0 : i32, i32
  }
  func.func @transform_16(%arg0: i32, %arg1: i32) -> (i32, i32) {
    %c0_i32 = arith.constant 0 : i32
    %c0_i32_0 = arith.constant 0 : i32
    %c0_i32_1 = arith.constant 0 : i32
    return %c0_i32, %c0_i32_0 : i32, i32
  }
}

</mosaic_0001>

<bundles_post_ra>
// kernel: gcn_forward.1
= control target key start
LH: loop header
LB: loop body
LE: loop exit
PB: predicated region body
PF: predicated region fallthrough
CT: control target
= control target key end

     0   :  { %s6230_s0 = inlined_call_operand.vmem [shape: bf16[512,512], index: 0, kind: input, shape index: {}]   ;;  %s6231_s1 = inlined_call_operand.vmem [shape: f32[1,512], index: 1, kind: input, shape index: {}]   ;;  %s6232_s2 = inlined_call_operand.vmem [shape: f32[8,1], index: 2, kind: input, shape index: {}]   ;;  %s6233_s3 = inlined_call_operand.vmem [shape: f32[8,1], index: 3, kind: input, shape index: {}]   ;;  %s6234_s4 = inlined_call_operand.vmem [shape: f32[8,1], index: 4, kind: input, shape index: {}]   ;;  %s6235_s5 = inlined_call_operand.vmem [shape: f32[8,1], index: 5, kind: input, shape index: {}]   ;;  %s6236_s6 = inlined_call_operand.vmem [shape: f32[8,1], index: 6, kind: input, shape index: {}]   ;;  %s6237_s7 = inlined_call_operand.<no memory space> [shape: f32[1,1], index: 7, kind: input, shape index: {}]   ;;  %s6238_s8 = inlined_call_operand.vmem [shape: f32[256,50], index: 8, kind: input, shape index: {}]   ;;  %s6239_s9 = inlined_call_operand.vmem [shape: f32[1,50], index: 9, kind: input, shape index: {}]   ;;  %s6240_s10 = inlined_call_operand.vmem [shape: f32[50,10], index: 10, kind: input, shape index: {}]   ;;  %s6241_s11 = inlined_call_operand.vmem [shape: f32[1,10], index: 11, kind: input, shape index: {}]   ;;  %s6242_s12 = inlined_call_operand.vmem [shape: f32[10,2], index: 12, kind: input, shape index: {}]   ;;  %s6243_s13 = inlined_call_operand.vmem [shape: f32[1,2], index: 13, kind: input, shape index: {}]   ;;  %s6244_s14 = inlined_call_operand.vmem [shape: f32[2,4], index: 14, kind: input, shape index: {}]   ;;  %s6245_s15 = inlined_call_operand.vmem [shape: f32[1,4], index: 15, kind: input, shape index: {}]   ;;  %s6246_s16 = inlined_call_operand.hbm [shape: f32[2,4], index: 16, kind: output, shape index: {}]  }
   0x1   :  { %6249 = sst [smem:[#allocation9_spill]] %s6230_s0  ;;  %v21_v0 = vstv %s6237_s7 }
   0x2   :  { %6250 = sst [smem:[#allocation10_spill]] %s6232_s2  ;;  %22 = vst [vmem:[#allocation5] sm:$0x1] %v21_v0 }
   0x3   :  { %23 = vsyncpa [#allocation7], 0  ;;  %s4421_s23 = smov 0   ;;  %s4423_s24 = smov 0  }
   0x4   :  { %s4425_s25 = smov 0  }
   0x5 LB: > { %s41_s26 = sadd.s32 1, %s4324_s24  ;;  %p2934_p1 = scmp.ge.s32.totalorder %s4328_s25, 1  ;;  %s4328_s25 = sphi %s4425_s25, %s29_s25   ;;  %s4324_s24 = sphi %s4423_s24, %s6256_s24   ;;  %s4320_s23 = sphi %s4421_s23, %s6255_s23  }
   0x6   : > { %p43_p0 = scmp.ge.s32.totalorder %s41_s26, 2  ;;  %p473_p2 = scmp.lt.s32.totalorder %s4328_s25, 3 }
   0x8   : > { %s6258_s26 = smov (%p43_p0, %s41_s26), 0  ;;  %p474_p3 = pnand %p2934_p1, %p473_p2 }
   0x9   : > { %p2935_p4 = scmp.ne.s32.totalorder (!%p474_p3), %s4320_s23, 0 }
   0xa   : > { %477 = sbr.rel (%p474_p3) target bundleno = 1479 (0x5c7), region = 84 }
   0xf   : > { %528 = sbr.rel (%p2935_p4) target bundleno = 348 (0x15c), region = 88  ;;  %s6251_s2 = sld [smem:[#allocation10_spill]] (!%p2935_p4) }
  0x10   : > { %s6252_s0 = sld [smem:[#allocation9_spill]] (!%p2935_p4) }
  0x14   : > { %v4330_v3 = vmov 0   ;;  %v685_v21 = vld [vmem:[%s6233_s3] sm:$0xff] }
  0x15   : > { %v530_v1 = vld [vmem:[%s6251_s2] sm:$0xff]  ;;  %4262 = vset.pattern.permute.xlu0 %v4330_v3  ;;  %4263 = vset.pattern.permute.xlu1 %v4330_v3 }
  0x16   : > { %v3050_v2 = vld [vmem:[%s6252_s0 + $0xe0] sm:$0xf]  ;;  %v4002_v4 = vld [vmem:[%s6252_s0 + $0xec] sm:$0xf0]  ;;  %533 = vperm.xlu0 %4262, %v530_v1  }
  0x17   : > { %v3178_v5 = vld [vmem:[%s6252_s0 + $0x1e0] sm:$0xf]  ;;  %v4034_v6 = vld [vmem:[%s6252_s0 + $0x1ec] sm:$0xf0]  ;;  %v3051_v7 = vor.u32 %v4002_v4, %v3050_v2 }
  0x18   : > { %v3179_v8 = vor.u32 %v4034_v6, %v3178_v5  ;;  %v3306_v9 = vld [vmem:[%s6252_s0 + $0x2e0] sm:$0xf]  ;;  %v4066_v10 = vld [vmem:[%s6252_s0 + $0x2ec] sm:$0xf0] }
  0x19   : > { %v3434_v11 = vld [vmem:[%s6252_s0 + $0x3e0] sm:$0xf]  ;;  %v3307_v12 = vor.u32 %v4066_v10, %v3306_v9  ;;  %v4098_v13 = vld [vmem:[%s6252_s0 + $0x3ec] sm:$0xf0]  ;;  %1344 = vmatpush.bf16.msra.mxu0 %v3051_v7 }
  0x1a   : > { %v3034_v14 = vld [vmem:[%s6252_s0 + $0xc0] sm:$0xf]  ;;  %v3998_v15 = vld [vmem:[%s6252_s0 + $0xcc] sm:$0xf0]  ;;  %1357 = vmatpush.bf16.msra.mxu1 %v3179_v8  ;;  %v3435_v16 = vor.u32 %v4098_v13, %v3434_v11 }
  0x1b   : > { %v3035_v17 = vor.u32 %v3998_v15, %v3034_v14  ;;  %v3162_v18 = vld [vmem:[%s6252_s0 + $0x1c0] sm:$0xf]  ;;  %v4030_v19 = vld [vmem:[%s6252_s0 + $0x1cc] sm:$0xf0]  ;;  %1370 = vmatpush.bf16.msra.mxu2 %v3307_v12 }
  0x1c   : > { %v3290_v20 = vld [vmem:[%s6252_s0 + $0x2c0] sm:$0xf]  ;;  %v3163_v22 = vor.u32 %v4030_v19, %v3162_v18  ;;  %v4062_v23 = vld [vmem:[%s6252_s0 + $0x2cc] sm:$0xf0]  ;;  %1383 = vmatpush.bf16.msra.mxu3 %v3435_v16 }
  0x1d   : > { %v3418_v24 = vld [vmem:[%s6252_s0 + $0x3c0] sm:$0xf]  ;;  %v4094_v25 = vld [vmem:[%s6252_s0 + $0x3cc] sm:$0xf0]  ;;  %v3291_v26 = vor.u32 %v4062_v23, %v3290_v20  ;;  %1345 = vmatpush.bf16.msra.mxu0 %v3035_v17 }
  0x1e   : > { %v3419_v27 = vor.u32 %v4094_v25, %v3418_v24  ;;  %v3018_v28 = vld [vmem:[%s6252_s0 + $0xa0] sm:$0xf]  ;;  %v3994_v29 = vld [vmem:[%s6252_s0 + $0xac] sm:$0xf0]  ;;  %1358 = vmatpush.bf16.msra.mxu1 %v3163_v22  ;;  %688 = vperm.xlu0 %4262, %v685_v21  }
  0x1f   : > { %v3146_v30 = vld [vmem:[%s6252_s0 + $0x1a0] sm:$0xf]  ;;  %v4026_v31 = vld [vmem:[%s6252_s0 + $0x1ac] sm:$0xf0]  ;;  %v3019_v34 = vor.u32 %v3994_v29, %v3018_v28  ;;  %1371 = vmatpush.bf16.msra.mxu2 %v3291_v26 }
  0x20   : > { %v3274_v32 = vld [vmem:[%s6252_s0 + $0x2a0] sm:$0xf]  ;;  %v4058_v33 = vld [vmem:[%s6252_s0 + $0x2ac] sm:$0xf0]  ;;  %v3147_v35 = vor.u32 %v4026_v31, %v3146_v30  ;;  %1384 = vmatpush.bf16.msra.mxu3 %v3419_v27 }
  0x21   : > { %v3402_v36 = vld [vmem:[%s6252_s0 + $0x3a0] sm:$0xf]  ;;  %v4090_v37 = vld [vmem:[%s6252_s0 + $0x3ac] sm:$0xf0]  ;;  %v3275_v39 = vor.u32 %v4058_v33, %v3274_v32  ;;  %1346 = vmatpush.bf16.msra.mxu0 %v3019_v34  ;;  %v4000_v32 = vld [vmem:[%s6252_s0 + $0xe4] sm:$0xf] }
  0x22   : > { %v3002_v38 = vld [vmem:[%s6252_s0 + $0x80] sm:$0xf]  ;;  %v3990_v40 = vld [vmem:[%s6252_s0 + $0x8c] sm:$0xf0]  ;;  %v3403_v43 = vor.u32 %v4090_v37, %v3402_v36  ;;  %1359 = vmatpush.bf16.msra.mxu1 %v3147_v35  ;;  %v3052_v33 = vld [vmem:[%s6252_s0 + $0xf0] sm:$0xf0] }
  0x23   : > { %v3130_v41 = vld [vmem:[%s6252_s0 + $0x180] sm:$0xf]  ;;  %v4022_v42 = vld [vmem:[%s6252_s0 + $0x18c] sm:$0xf0]  ;;  %v3003_v48 = vor.u32 %v3990_v40, %v3002_v38  ;;  %1372 = vmatpush.bf16.msra.mxu2 %v3275_v39  ;;  %v4032_v34 = vld [vmem:[%s6252_s0 + $0x1e4] sm:$0xf] }
  0x24   : > { %v3258_v44 = vld [vmem:[%s6252_s0 + $0x280] sm:$0xf]  ;;  %v4054_v45 = vld [vmem:[%s6252_s0 + $0x28c] sm:$0xf0]  ;;  %v3131_v49 = vor.u32 %v4022_v42, %v3130_v41  ;;  %1385 = vmatpush.bf16.msra.mxu3 %v3403_v43  ;;  %v3180_v35 = vld [vmem:[%s6252_s0 + $0x1f0] sm:$0xf0]  ;;  %v3055_v43 = vor.u32 %v4000_v32, %v3052_v33 }
  0x25   : > { %v3386_v46 = vld [vmem:[%s6252_s0 + $0x380] sm:$0xf]  ;;  %v4086_v47 = vld [vmem:[%s6252_s0 + $0x38c] sm:$0xf0]  ;;  %v3259_v51 = vor.u32 %v4054_v45, %v3258_v44  ;;  %1347 = vmatpush.bf16.msra.mxu0 %v3003_v48  ;;  %v4064_v36 = vld [vmem:[%s6252_s0 + $0x2e4] sm:$0xf]  ;;  %v3183_v45 = vor.u32 %v4032_v34, %v3180_v35 }
  0x26   : > { %v2986_v50 = vld [vmem:[%s6252_s0 + $0x60] sm:$0xf]  ;;  %v3986_v52 = vld [vmem:[%s6252_s0 + $0x6c] sm:$0xf0]  ;;  %v3387_v55 = vor.u32 %v4086_v47, %v3386_v46  ;;  %1360 = vmatpush.bf16.msra.mxu1 %v3131_v49  ;;  %v3308_v39 = vld [vmem:[%s6252_s0 + $0x2f0] sm:$0xf0] }
  0x27   : > { %v3114_v53 = vld [vmem:[%s6252_s0 + $0x160] sm:$0xf]  ;;  %v4018_v54 = vld [vmem:[%s6252_s0 + $0x16c] sm:$0xf0]  ;;  %v2987_v60 = vor.u32 %v3986_v52, %v2986_v50  ;;  %1373 = vmatpush.bf16.msra.mxu2 %v3259_v51  ;;  %v4096_v40 = vld [vmem:[%s6252_s0 + $0x3e4] sm:$0xf]  ;;  %v3311_v48 = vor.u32 %v4064_v36, %v3308_v39 }
  0x28   : > { %v3242_v56 = vld [vmem:[%s6252_s0 + $0x260] sm:$0xf]  ;;  %v4050_v57 = vld [vmem:[%s6252_s0 + $0x26c] sm:$0xf0]  ;;  %v3115_v61 = vor.u32 %v4018_v54, %v3114_v53  ;;  %1386 = vmatpush.bf16.msra.mxu3 %v3387_v55  ;;  %v3436_v41 = vld [vmem:[%s6252_s0 + $0x3f0] sm:$0xf0] }
  0x29   : > { %v3370_v58 = vld [vmem:[%s6252_s0 + $0x360] sm:$0xf]  ;;  %v4082_v59 = vld [vmem:[%s6252_s0 + $0x36c] sm:$0xf0]  ;;  %v3243_v63 = vor.u32 %v4050_v57, %v3242_v56  ;;  %1348 = vmatpush.bf16.msra.mxu0 %v2987_v60  ;;  %v3996_v46 = vld [vmem:[%s6252_s0 + $0xc4] sm:$0xf]  ;;  %v3439_v49 = vor.u32 %v4096_v40, %v3436_v41 }
  0x2a   : > { %v2970_v62 = vld [vmem:[%s6252_s0 + $0x40] sm:$0xf]  ;;  %v3982_v0 = vld [vmem:[%s6252_s0 + $0x4c] sm:$0xf0]  ;;  %v3371_v3 = vor.u32 %v4082_v59, %v3370_v58  ;;  %1361 = vmatpush.bf16.msra.mxu1 %v3115_v61  ;;  %v3036_v47 = vld [vmem:[%s6252_s0 + $0xd0] sm:$0xf0] }
  0x2b   : > { %v3098_v1 = vld [vmem:[%s6252_s0 + $0x140] sm:$0xf]  ;;  %v4014_v2 = vld [vmem:[%s6252_s0 + $0x14c] sm:$0xf0]  ;;  %v2971_v8 = vor.u32 %v3982_v0, %v2970_v62  ;;  %1374 = vmatpush.bf16.msra.mxu2 %v3243_v63  ;;  %v4028_v50 = vld [vmem:[%s6252_s0 + $0x1c4] sm:$0xf]  ;;  %v3039_v56 = vor.u32 %v3996_v46, %v3036_v47 }
  0x2c   : > { %v3226_v4 = vld [vmem:[%s6252_s0 + $0x240] sm:$0xf]  ;;  %v4046_v5 = vld [vmem:[%s6252_s0 + $0x24c] sm:$0xf0]  ;;  %v3099_v9 = vor.u32 %v4014_v2, %v3098_v1  ;;  %1387 = vmatpush.bf16.msra.mxu3 %v3371_v3  ;;  %v3164_v51 = vld [vmem:[%s6252_s0 + $0x1d0] sm:$0xf0] }
  0x2d   : > { %v3354_v6 = vld [vmem:[%s6252_s0 + $0x340] sm:$0xf]  ;;  %v4078_v7 = vld [vmem:[%s6252_s0 + $0x34c] sm:$0xf0]  ;;  %v3227_v11 = vor.u32 %v4046_v5, %v3226_v4  ;;  %1349 = vmatpush.bf16.msra.mxu0 %v2971_v8  ;;  %v4060_v52 = vld [vmem:[%s6252_s0 + $0x2c4] sm:$0xf]  ;;  %v3167_v57 = vor.u32 %v4028_v50, %v3164_v51 }
  0x2e   : > { %v2954_v10 = vld [vmem:[%s6252_s0 + $0x20] sm:$0xf]  ;;  %v3978_v12 = vld [vmem:[%s6252_s0 + $0x2c] sm:$0xf0]  ;;  %v3355_v15 = vor.u32 %v4078_v7, %v3354_v6  ;;  %1362 = vmatpush.bf16.msra.mxu1 %v3099_v9  ;;  %v3292_v53 = vld [vmem:[%s6252_s0 + $0x2d0] sm:$0xf0] }
  0x2f   : > { %v3082_v13 = vld [vmem:[%s6252_s0 + $0x120] sm:$0xf]  ;;  %v4010_v14 = vld [vmem:[%s6252_s0 + $0x12c] sm:$0xf0]  ;;  %v2955_v21 = vor.u32 %v3978_v12, %v2954_v10  ;;  %1375 = vmatpush.bf16.msra.mxu2 %v3227_v11  ;;  %v4092_v54 = vld [vmem:[%s6252_s0 + $0x3c4] sm:$0xf]  ;;  %v3295_v60 = vor.u32 %v4060_v52, %v3292_v53 }
  0x30   : > { %v3210_v16 = vld [vmem:[%s6252_s0 + $0x220] sm:$0xf]  ;;  %v4042_v17 = vld [vmem:[%s6252_s0 + $0x22c] sm:$0xf0]  ;;  %v3083_v22 = vor.u32 %v4010_v14, %v3082_v13  ;;  %1388 = vmatpush.bf16.msra.mxu3 %v3355_v15  ;;  %v3420_v55 = vld [vmem:[%s6252_s0 + $0x3d0] sm:$0xf0] }
  0x31   : > { %v3338_v18 = vld [vmem:[%s6252_s0 + $0x320] sm:$0xf]  ;;  %v4074_v19 = vld [vmem:[%s6252_s0 + $0x32c] sm:$0xf0]  ;;  %v3211_v26 = vor.u32 %v4042_v17, %v3210_v16  ;;  %1350 = vmatpush.bf16.msra.mxu0 %v2955_v21  ;;  %v3992_v58 = vld [vmem:[%s6252_s0 + $0xa4] sm:$0xf]  ;;  %v3423_v61 = vor.u32 %v4092_v54, %v3420_v55 }
  0x32   : > { %v2938_v20 = vld [vmem:[%s6252_s0] sm:$0xf]  ;;  %v3974_v23 = vld [vmem:[%s6252_s0 + $0xc] sm:$0xf0]  ;;  %v3339_v30 = vor.u32 %v4074_v19, %v3338_v18  ;;  %1363 = vmatpush.bf16.msra.mxu1 %v3083_v22  ;;  %v3020_v59 = vld [vmem:[%s6252_s0 + $0xb0] sm:$0xf0] }
  0x33   : > { %v3066_v24 = vld [vmem:[%s6252_s0 + $0x100] sm:$0xf]  ;;  %v4006_v25 = vld [vmem:[%s6252_s0 + $0x10c] sm:$0xf0]  ;;  %v2939_v37 = vor.u32 %v3974_v23, %v2938_v20  ;;  %1376 = vmatpush.bf16.msra.mxu2 %v3211_v26  ;;  %v4024_v62 = vld [vmem:[%s6252_s0 + $0x1a4] sm:$0xf]  ;;  %v3023_v4 = vor.u32 %v3992_v58, %v3020_v59 }
  0x34   : > { %v3194_v27 = vld [vmem:[%s6252_s0 + $0x200] sm:$0xf]  ;;  %v4038_v28 = vld [vmem:[%s6252_s0 + $0x20c] sm:$0xf0]  ;;  %v3067_v38 = vor.u32 %v4006_v25, %v3066_v24  ;;  %1389 = vmatpush.bf16.msra.mxu3 %v3339_v30  ;;  %v3148_v63 = vld [vmem:[%s6252_s0 + $0x1b0] sm:$0xf0] }
  0x35   : > { %v3322_v29 = vld [vmem:[%s6252_s0 + $0x300] sm:$0xf]  ;;  %v4070_v31 = vld [vmem:[%s6252_s0 + $0x30c] sm:$0xf0]  ;;  %v3195_v42 = vor.u32 %v4038_v28, %v3194_v27  ;;  %1351 = vmatpush.bf16.msra.mxu0 %v2939_v37  ;;  %v4056_v0 = vld [vmem:[%s6252_s0 + $0x2a4] sm:$0xf]  ;;  %v3151_v5 = vor.u32 %v4024_v62, %v3148_v63 }
  0x36   : > { %v3323_v44 = vor.u32 %v4070_v31, %v3322_v29  ;;  %1364 = vmatpush.bf16.msra.mxu1 %v3067_v38  ;;  %v3276_v1 = vld [vmem:[%s6252_s0 + $0x2b0] sm:$0xf0]  ;;  %v4088_v2 = vld [vmem:[%s6252_s0 + $0x3a4] sm:$0xf] }
  0x37   : > { %1377 = vmatpush.bf16.msra.mxu2 %v3195_v42  ;;  %v3404_v3 = vld [vmem:[%s6252_s0 + $0x3b0] sm:$0xf0]  ;;  %v3988_v6 = vld [vmem:[%s6252_s0 + $0x84] sm:$0xf]  ;;  %v3279_v8 = vor.u32 %v4056_v0, %v3276_v1 }
  0x38   : > { %1390 = vmatpush.bf16.msra.mxu3 %v3323_v44  ;;  %v3004_v7 = vld [vmem:[%s6252_s0 + $0x90] sm:$0xf0]  ;;  %v3407_v9 = vor.u32 %v4088_v2, %v3404_v3  ;;  %v4020_v10 = vld [vmem:[%s6252_s0 + $0x184] sm:$0xf] }
  0x39   : > { %1396 = vmatpush.bf16.msrb.mxu0 %v3055_v43  ;;  %v3132_v11 = vld [vmem:[%s6252_s0 + $0x190] sm:$0xf0]  ;;  %v4052_v12 = vld [vmem:[%s6252_s0 + $0x284] sm:$0xf]  ;;  %v3007_v16 = vor.u32 %v3988_v6, %v3004_v7 }
  0x3a   : > { %1409 = vmatpush.bf16.msrb.mxu1 %v3183_v45  ;;  %v3260_v13 = vld [vmem:[%s6252_s0 + $0x290] sm:$0xf0]  ;;  %v4084_v14 = vld [vmem:[%s6252_s0 + $0x384] sm:$0xf]  ;;  %v3135_v17 = vor.u32 %v4020_v10, %v3132_v11  ;;  %v3058_v10 = vld [vmem:[%s6252_s0 + $0xe8] sm:$0xf] }
  0x3b   : > { %1422 = vmatpush.bf16.msrb.mxu2 %v3311_v48  ;;  %v3388_v15 = vld [vmem:[%s6252_s0 + $0x390] sm:$0xf0]  ;;  %v3984_v18 = vld [vmem:[%s6252_s0 + $0x64] sm:$0xf]  ;;  %v3263_v20 = vor.u32 %v4052_v12, %v3260_v13  ;;  %v4003_v11 = vld [vmem:[%s6252_s0 + $0xf4] sm:$0xf0] }
  0x3c   : > { %1435 = vmatpush.bf16.msrb.mxu3 %v3439_v49  ;;  %v2988_v19 = vld [vmem:[%s6252_s0 + $0x70] sm:$0xf0]  ;;  %v3391_v21 = vor.u32 %v4084_v14, %v3388_v15  ;;  %v4016_v22 = vld [vmem:[%s6252_s0 + $0x164] sm:$0xf]  ;;  %v3186_v12 = vld [vmem:[%s6252_s0 + $0x1e8] sm:$0xf] }
  0x3d   : > { %1397 = vmatpush.bf16.msrb.mxu0 %v3039_v56  ;;  %v3116_v23 = vld [vmem:[%s6252_s0 + $0x170] sm:$0xf0]  ;;  %v4048_v24 = vld [vmem:[%s6252_s0 + $0x264] sm:$0xf]  ;;  %v2991_v28 = vor.u32 %v3984_v18, %v2988_v19  ;;  %v4035_v13 = vld [vmem:[%s6252_s0 + $0x1f4] sm:$0xf0] }
  0x3e   : > { %1410 = vmatpush.bf16.msrb.mxu1 %v3167_v57  ;;  %v3244_v25 = vld [vmem:[%s6252_s0 + $0x270] sm:$0xf0]  ;;  %v4080_v26 = vld [vmem:[%s6252_s0 + $0x364] sm:$0xf]  ;;  %v3119_v29 = vor.u32 %v4016_v22, %v3116_v23  ;;  %v3314_v15 = vld [vmem:[%s6252_s0 + $0x2e8] sm:$0xf]  ;;  %v3059_v23 = vor.u32 %v4003_v11, %v3058_v10 }
  0x3f   : > { %1423 = vmatpush.bf16.msrb.mxu2 %v3295_v60  ;;  %v3372_v27 = vld [vmem:[%s6252_s0 + $0x370] sm:$0xf0]  ;;  %v3980_v30 = vld [vmem:[%s6252_s0 + $0x44] sm:$0xf]  ;;  %v3247_v32 = vor.u32 %v4048_v24, %v3244_v25  ;;  %v4099_v22 = vld [vmem:[%s6252_s0 + $0x3f4] sm:$0xf0]  ;;  %v3187_v24 = vor.u32 %v4035_v13, %v3186_v12 }
  0x40   : > { %1436 = vmatpush.bf16.msrb.mxu3 %v3423_v61  ;;  %v2972_v31 = vld [vmem:[%s6252_s0 + $0x50] sm:$0xf0]  ;;  %v3375_v33 = vor.u32 %v4080_v26, %v3372_v27  ;;  %v4012_v34 = vld [vmem:[%s6252_s0 + $0x144] sm:$0xf]  ;;  %v4083_v10 = vld [vmem:[%s6252_s0 + $0x374] sm:$0xf0] }
  0x41   : > { %1398 = vmatpush.bf16.msrb.mxu0 %v3023_v4  ;;  %v3100_v35 = vld [vmem:[%s6252_s0 + $0x150] sm:$0xf0]  ;;  %v4044_v36 = vld [vmem:[%s6252_s0 + $0x244] sm:$0xf]  ;;  %v2975_v40 = vor.u32 %v3980_v30, %v2972_v31  ;;  %v529_v4 = vld [vmem:[%s6231_s1] sm:$0xf] }
  0x42   : > { %1411 = vmatpush.bf16.msrb.mxu1 %v3151_v5  ;;  %v3228_v37 = vld [vmem:[%s6252_s0 + $0x250] sm:$0xf0]  ;;  %v4076_v38 = vld [vmem:[%s6252_s0 + $0x344] sm:$0xf]  ;;  %v3103_v41 = vor.u32 %v4012_v34, %v3100_v35  ;;  %v537_v6 = vperm.slane %v529_v4, 0  ;;  %v538_v7 = vperm.slane %v529_v4, 1 }
  0x43   : > { %1424 = vmatpush.bf16.msrb.mxu2 %v3279_v8  ;;  %v3356_v39 = vld [vmem:[%s6252_s0 + $0x350] sm:$0xf0]  ;;  %v3976_v42 = vld [vmem:[%s6252_s0 + $0x24] sm:$0xf]  ;;  %v3231_v44 = vor.u32 %v4044_v36, %v3228_v37  ;;  %v539_v8 = vperm.slane %v529_v4, 2 }
  0x44   : > { %1437 = vmatpush.bf16.msrb.mxu3 %v3407_v9  ;;  %v2956_v43 = vld [vmem:[%s6252_s0 + $0x30] sm:$0xf0]  ;;  %v3359_v45 = vor.u32 %v4076_v38, %v3356_v39  ;;  %v4008_v46 = vld [vmem:[%s6252_s0 + $0x124] sm:$0xf]  ;;  %v540_v9 = vperm.slane %v529_v4, 3 }
  0x45   : > { %1399 = vmatpush.bf16.msrb.mxu0 %v3007_v16  ;;  %v3084_v47 = vld [vmem:[%s6252_s0 + $0x130] sm:$0xf0]  ;;  %v4040_v48 = vld [vmem:[%s6252_s0 + $0x224] sm:$0xf]  ;;  %v2959_v52 = vor.u32 %v3976_v42, %v2956_v43  ;;  %v3999_v30 = vld [vmem:[%s6252_s0 + $0xd4] sm:$0xf0] }
  0x46   : > { %1412 = vmatpush.bf16.msrb.mxu1 %v3135_v17  ;;  %v3212_v49 = vld [vmem:[%s6252_s0 + $0x230] sm:$0xf0]  ;;  %v4072_v50 = vld [vmem:[%s6252_s0 + $0x324] sm:$0xf]  ;;  %v3087_v53 = vor.u32 %v4008_v46, %v3084_v47  ;;  %v4031_v34 = vld [vmem:[%s6252_s0 + $0x1d4] sm:$0xf0] }
  0x47   : > { %1425 = vmatpush.bf16.msrb.mxu2 %v3263_v20  ;;  %v3340_v51 = vld [vmem:[%s6252_s0 + $0x330] sm:$0xf0]  ;;  %v3215_v54 = vor.u32 %v4040_v48, %v3212_v49  ;;  %v3972_v56 = vld [vmem:[%s6252_s0 + $0x4] sm:$0xf]  ;;  %v4067_v20 = vld [vmem:[%s6252_s0 + $0x2f4] sm:$0xf0] }
  0x48   : > { %1438 = vmatpush.bf16.msrb.mxu3 %v3391_v21  ;;  %v3343_v55 = vor.u32 %v4072_v50, %v3340_v51  ;;  %v2940_v57 = vld [vmem:[%s6252_s0 + $0x10] sm:$0xf0]  ;;  %v4004_v58 = vld [vmem:[%s6252_s0 + $0x104] sm:$0xf]  ;;  %v3442_v21 = vld [vmem:[%s6252_s0 + $0x3e8] sm:$0xf]  ;;  %v3315_v31 = vor.u32 %v4067_v20, %v3314_v15 }
  0x49   : > { %1400 = vmatpush.bf16.msrb.mxu0 %v2991_v28  ;;  %v2943_v59 = vor.u32 %v3972_v56, %v2940_v57  ;;  %v3068_v60 = vld [vmem:[%s6252_s0 + $0x110] sm:$0xf0]  ;;  %v4036_v61 = vld [vmem:[%s6252_s0 + $0x204] sm:$0xf]  ;;  %v3298_v35 = vld [vmem:[%s6252_s0 + $0x2c8] sm:$0xf] }
  0x4a   : > { %1413 = vmatpush.bf16.msrb.mxu1 %v3119_v29  ;;  %v3196_v62 = vld [vmem:[%s6252_s0 + $0x210] sm:$0xf0]  ;;  %v3071_v63 = vor.u32 %v4004_v58, %v3068_v60  ;;  %v4068_v1 = vld [vmem:[%s6252_s0 + $0x304] sm:$0xf]  ;;  %v3042_v29 = vld [vmem:[%s6252_s0 + $0xc8] sm:$0xf] }
  0x4b   : > { %1426 = vmatpush.bf16.msrb.mxu2 %v3247_v32  ;;  %v3199_v0 = vor.u32 %v4036_v61, %v3196_v62  ;;  %v3324_v2 = vld [vmem:[%s6252_s0 + $0x310] sm:$0xf0]  ;;  %v1552_v5 = vld [vmem:[%s6234_s4] sm:$0xff]  ;;  %v3443_v32 = vor.u32 %v4099_v22, %v3442_v21  ;;  %v4063_v36 = vld [vmem:[%s6252_s0 + $0x2d4] sm:$0xf0]  ;;  %v3043_v39 = vor.u32 %v3999_v30, %v3042_v29 }
  0x4c   : > { %1439 = vmatpush.bf16.msrb.mxu3 %v3375_v33  ;;  %v3327_v3 = vor.u32 %v4068_v1, %v3324_v2  ;;  %1555 = vperm.xlu1 %4263, %v1552_v5   ;;  %v3170_v33 = vld [vmem:[%s6252_s0 + $0x1c8] sm:$0xf]  ;;  %v4095_v38 = vld [vmem:[%s6252_s0 + $0x3d4] sm:$0xf0]  ;;  %v3299_v43 = vor.u32 %v4063_v36, %v3298_v35 }
  0x4d   : > { %1401 = vmatpush.bf16.msrb.mxu0 %v2975_v40  ;;  %v3426_v37 = vld [vmem:[%s6252_s0 + $0x3c8] sm:$0xf]  ;;  %v3171_v40 = vor.u32 %v4031_v34, %v3170_v33  ;;  %v3995_v42 = vld [vmem:[%s6252_s0 + $0xb4] sm:$0xf0] }
  0x4e   : > { %1414 = vmatpush.bf16.msrb.mxu1 %v3103_v41  ;;  %v3026_v41 = vld [vmem:[%s6252_s0 + $0xa8] sm:$0xf]  ;;  %v4027_v46 = vld [vmem:[%s6252_s0 + $0x1b4] sm:$0xf0] }
  0x4f   : > { %1427 = vmatpush.bf16.msrb.mxu2 %v3231_v44  ;;  %v3427_v44 = vor.u32 %v4095_v38, %v3426_v37  ;;  %v3282_v47 = vld [vmem:[%s6252_s0 + $0x2a8] sm:$0xf]  ;;  %v4059_v48 = vld [vmem:[%s6252_s0 + $0x2b4] sm:$0xf0]  ;;  %v3027_v51 = vor.u32 %v3995_v42, %v3026_v41 }
  0x50   : > { %1440 = vmatpush.bf16.msrb.mxu3 %v3359_v45  ;;  %v3154_v45 = vld [vmem:[%s6252_s0 + $0x1a8] sm:$0xf]  ;;  %v4091_v50 = vld [vmem:[%s6252_s0 + $0x3b4] sm:$0xf0] }
  0x51   : > { %1402 = vmatpush.bf16.msrb.mxu0 %v2959_v52  ;;  %v3410_v49 = vld [vmem:[%s6252_s0 + $0x3a8] sm:$0xf]  ;;  %v3155_v52 = vor.u32 %v4027_v46, %v3154_v45  ;;  %v4023_v58 = vld [vmem:[%s6252_s0 + $0x194] sm:$0xf0] }
  0x52   : > { %1415 = vmatpush.bf16.msrb.mxu1 %v3087_v53  ;;  %v3010_v53 = vld [vmem:[%s6252_s0 + $0x88] sm:$0xf]  ;;  %v3411_v56 = vor.u32 %v4091_v50, %v3410_v49  ;;  %v4055_v60 = vld [vmem:[%s6252_s0 + $0x294] sm:$0xf0] }
  0x53   : > { %1428 = vmatpush.bf16.msrb.mxu2 %v3215_v54  ;;  %v3991_v54 = vld [vmem:[%s6252_s0 + $0x94] sm:$0xf0]  ;;  %v3138_v57 = vld [vmem:[%s6252_s0 + $0x188] sm:$0xf] }
  0x54   : > { %1441 = vmatpush.bf16.msrb.mxu3 %v3343_v55  ;;  %v3283_v55 = vor.u32 %v4059_v48, %v3282_v47  ;;  %v3394_v61 = vld [vmem:[%s6252_s0 + $0x388] sm:$0xf]  ;;  %v4087_v62 = vld [vmem:[%s6252_s0 + $0x394] sm:$0xf0] }
  0x55   : > { %1403 = vmatpush.bf16.msrb.mxu0 %v2943_v59  ;;  %v3266_v59 = vld [vmem:[%s6252_s0 + $0x288] sm:$0xf]  ;;  %v3987_v2 = vld [vmem:[%s6252_s0 + $0x74] sm:$0xf0]  ;;  %v3395_v4 = vor.u32 %v4087_v62, %v3394_v61 }
  0x56   : > { %1416 = vmatpush.bf16.msrb.mxu1 %v3071_v63  ;;  %v3011_v63 = vor.u32 %v3991_v54, %v3010_v53  ;;  %v2994_v1 = vld [vmem:[%s6252_s0 + $0x68] sm:$0xf]  ;;  %v4047_v20 = vld [vmem:[%s6252_s0 + $0x254] sm:$0xf0]  ;;  %v4033_v53 = vld [vmem:[%s6252_s0 + $0x1ec] sm:$0xf] }
  0x57   : > { %1429 = vmatpush.bf16.msrb.mxu2 %v3199_v0  ;;  %v3139_v0 = vor.u32 %v4023_v58, %v3138_v57  ;;  %v3122_v5 = vld [vmem:[%s6252_s0 + $0x168] sm:$0xf]  ;;  %v2995_v11 = vor.u32 %v3987_v2, %v2994_v1  ;;  %v4079_v22 = vld [vmem:[%s6252_s0 + $0x354] sm:$0xf0]  ;;  %v3188_v54 = vld [vmem:[%s6252_s0 + $0x1f8] sm:$0xf0] }
  0x58   : > { %1442 = vmatpush.bf16.msrb.mxu3 %v3327_v3  ;;  %v3267_v3 = vor.u32 %v4055_v60, %v3266_v59  ;;  %v2978_v13 = vld [vmem:[%s6252_s0 + $0x48] sm:$0xf]  ;;  %v3979_v30 = vld [vmem:[%s6252_s0 + $0x34] sm:$0xf0]  ;;  %v3316_v58 = vld [vmem:[%s6252_s0 + $0x2f8] sm:$0xf0] }
  0x59   : > { %v3362_v21 = vld [vmem:[%s6252_s0 + $0x348] sm:$0xf]  ;;  %v4011_v34 = vld [vmem:[%s6252_s0 + $0x134] sm:$0xf0]  ;;  %v4097_v59 = vld [vmem:[%s6252_s0 + $0x3ec] sm:$0xf] }
  0x5a   : > { %v2962_v29 = vld [vmem:[%s6252_s0 + $0x28] sm:$0xf]  ;;  %v4043_v36 = vld [vmem:[%s6252_s0 + $0x234] sm:$0xf0]  ;;  %v3444_v60 = vld [vmem:[%s6252_s0 + $0x3f8] sm:$0xf0] }
  0x5b   : > { %v3090_v33 = vld [vmem:[%s6252_s0 + $0x128] sm:$0xf]  ;;  %v4075_v38 = vld [vmem:[%s6252_s0 + $0x334] sm:$0xf0]  ;;  %v3997_v1 = vld [vmem:[%s6252_s0 + $0xcc] sm:$0xf] }
  0x5c   : > { %v3218_v35 = vld [vmem:[%s6252_s0 + $0x228] sm:$0xf]  ;;  %v3091_v41 = vor.u32 %v4011_v34, %v3090_v33  ;;  %v3975_v42 = vld [vmem:[%s6252_s0 + $0x14] sm:$0xf0]  ;;  %v3044_v2 = vld [vmem:[%s6252_s0 + $0xd8] sm:$0xf0] }
  0x5d   : > { %v3346_v37 = vld [vmem:[%s6252_s0 + $0x328] sm:$0xf]  ;;  %v3219_v45 = vor.u32 %v4043_v36, %v3218_v35  ;;  %v4039_v48 = vld [vmem:[%s6252_s0 + $0x214] sm:$0xf0]  ;;  %v4021_v33 = vld [vmem:[%s6252_s0 + $0x18c] sm:$0xf] }
  0x5e   : > { %v3347_v46 = vor.u32 %v4075_v38, %v3346_v37  ;;  %v3202_v47 = vld [vmem:[%s6252_s0 + $0x208] sm:$0xf]  ;;  %v4071_v50 = vld [vmem:[%s6252_s0 + $0x314] sm:$0xf0]  ;;  %v3140_v34 = vld [vmem:[%s6252_s0 + $0x198] sm:$0xf0] }
  0x5f   : > { %v3330_v49 = vld [vmem:[%s6252_s0 + $0x308] sm:$0xf]  ;;  %v3203_v61 = vor.u32 %v4039_v48, %v3202_v47  ;;  %v4053_v35 = vld [vmem:[%s6252_s0 + $0x28c] sm:$0xf]  ;;  %v3268_v36 = vld [vmem:[%s6252_s0 + $0x298] sm:$0xf0] }
  0x60   : > { %v3331_v62 = vor.u32 %v4071_v50, %v3330_v49  ;;  %v4085_v37 = vld [vmem:[%s6252_s0 + $0x38c] sm:$0xf]  ;;  %v3396_v38 = vld [vmem:[%s6252_s0 + $0x398] sm:$0xf0] }
  0x61   : > { %v4049_v47 = vld [vmem:[%s6252_s0 + $0x26c] sm:$0xf]  ;;  %v3252_v48 = vld [vmem:[%s6252_s0 + $0x278] sm:$0xf0] }
  0x62   : > { %v4081_v49 = vld [vmem:[%s6252_s0 + $0x36c] sm:$0xf]  ;;  %v3380_v50 = vld [vmem:[%s6252_s0 + $0x378] sm:$0xf0] }
  0x88   : > { %v534_v14 = vpop.permute.xlu0 %533 }
  0x89   : > { %v545_v16 = vmul.f32 %v537_v6, %v534_v14  ;;  %v546_v17 = vmul.f32 %v538_v7, %v534_v14  ;;  %v547_v18 = vmul.f32 %v539_v8, %v534_v14  ;;  %v548_v19 = vmul.f32 %v540_v9, %v534_v14  ;;  %v4019_v6 = vld [vmem:[%s6252_s0 + $0x174] sm:$0xf0]  ;;  %v3250_v7 = vld [vmem:[%s6252_s0 + $0x268] sm:$0xf] }
  0x8a   : > { %v4051_v8 = vld [vmem:[%s6252_s0 + $0x274] sm:$0xf0]  ;;  %v3378_v9 = vld [vmem:[%s6252_s0 + $0x368] sm:$0xf]  ;;  %v3123_v12 = vor.u32 %v4019_v6, %v3122_v5  ;;  %v4029_v5 = vld [vmem:[%s6252_s0 + $0x1cc] sm:$0xf] }
  0x8b   : > { %v4863_v25 = vpack.c.bf16 %v545_v16, %v545_v16  ;;  %v4865_v26 = vpack.c.bf16 %v546_v17, %v546_v17  ;;  %v4867_v27 = vpack.c.bf16 %v547_v18, %v547_v18  ;;  %v4869_v28 = vpack.c.bf16 %v548_v19, %v548_v19  ;;  %v3983_v14 = vld [vmem:[%s6252_s0 + $0x54] sm:$0xf0]  ;;  %v3106_v17 = vld [vmem:[%s6252_s0 + $0x148] sm:$0xf]  ;;  %v3172_v6 = vld [vmem:[%s6252_s0 + $0x1d8] sm:$0xf0] }
  0x8c   : > { %v3251_v15 = vor.u32 %v4051_v8, %v3250_v7  ;;  %v3379_v16 = vor.u32 %v4083_v10, %v3378_v9  ;;  %v4015_v18 = vld [vmem:[%s6252_s0 + $0x154] sm:$0xf0]  ;;  %v3234_v19 = vld [vmem:[%s6252_s0 + $0x248] sm:$0xf]  ;;  %v4061_v7 = vld [vmem:[%s6252_s0 + $0x2cc] sm:$0xf] }
  0x8d   : > { %1352 = vmatmul.bf16.vlgmr.msra.gmra.mxu0 %v4863_v25  ;;  %1365 = vmatmul.bf16.vlgmr.msra.gmra.mxu1 %v4865_v26  ;;  %v3300_v8 = vld [vmem:[%s6252_s0 + $0x2d8] sm:$0xf0]  ;;  %v4093_v9 = vld [vmem:[%s6252_s0 + $0x3cc] sm:$0xf] }
  0x8e   : > { %1378 = vmatmul.bf16.vlgmr.msra.gmra.mxu2 %v4867_v27  ;;  %1391 = vmatmul.bf16.vlgmr.msra.gmra.mxu3 %v4869_v28  ;;  %v3428_v10 = vld [vmem:[%s6252_s0 + $0x3d8] sm:$0xf0] }
  0x8f   : > { %1448 = vmatpush.bf16.msra.mxu0 %v3059_v23  ;;  %1461 = vmatpush.bf16.msra.mxu1 %v3187_v24  ;;  %v2979_v23 = vor.u32 %v3983_v14, %v2978_v13  ;;  %v3107_v24 = vor.u32 %v4015_v18, %v3106_v17  ;;  %v3993_v13 = vld [vmem:[%s6252_s0 + $0xac] sm:$0xf]  ;;  %v3028_v14 = vld [vmem:[%s6252_s0 + $0xb8] sm:$0xf0] }
  0x90   : > { %1474 = vmatpush.bf16.msra.mxu2 %v3315_v31  ;;  %1487 = vmatpush.bf16.msra.mxu3 %v3443_v32  ;;  %v3235_v31 = vor.u32 %v4047_v20, %v3234_v19  ;;  %v3363_v32 = vor.u32 %v4079_v22, %v3362_v21  ;;  %v4025_v17 = vld [vmem:[%s6252_s0 + $0x1ac] sm:$0xf]  ;;  %v3156_v18 = vld [vmem:[%s6252_s0 + $0x1b8] sm:$0xf0] }
  0x91   : > { %v4057_v19 = vld [vmem:[%s6252_s0 + $0x2ac] sm:$0xf]  ;;  %v3284_v20 = vld [vmem:[%s6252_s0 + $0x2b8] sm:$0xf0] }
  0x92   : > { %v4089_v21 = vld [vmem:[%s6252_s0 + $0x3ac] sm:$0xf]  ;;  %v3412_v22 = vld [vmem:[%s6252_s0 + $0x3b8] sm:$0xf0] }
  0x93   : > { %1449 = vmatpush.bf16.msra.mxu0 %v3043_v39  ;;  %1462 = vmatpush.bf16.msra.mxu1 %v3171_v40  ;;  %v2946_v39 = vld [vmem:[%s6252_s0 + $0x8] sm:$0xf]  ;;  %v2963_v40 = vor.u32 %v3979_v30, %v2962_v29  ;;  %v3989_v29 = vld [vmem:[%s6252_s0 + $0x8c] sm:$0xf]  ;;  %v3012_v30 = vld [vmem:[%s6252_s0 + $0x98] sm:$0xf0] }
  0x94   : > { %1475 = vmatpush.bf16.msra.mxu2 %v3299_v43  ;;  %1488 = vmatpush.bf16.msra.mxu3 %v3427_v44  ;;  %v3074_v43 = vld [vmem:[%s6252_s0 + $0x108] sm:$0xf]  ;;  %v4007_v44 = vld [vmem:[%s6252_s0 + $0x114] sm:$0xf0] }
  0x95   : > { %v3075_v57 = vor.u32 %v4007_v44, %v3074_v43  ;;  %v3271_v43 = vor.u32 %v4053_v35, %v3268_v36  ;;  %v3399_v44 = vor.u32 %v4085_v37, %v3396_v38 }
  0x97   : > { %1450 = vmatpush.bf16.msra.mxu0 %v3027_v51  ;;  %1463 = vmatpush.bf16.msra.mxu1 %v3155_v52  ;;  %v4001_v51 = vld [vmem:[%s6252_s0 + $0xec] sm:$0xf]  ;;  %v3060_v52 = vld [vmem:[%s6252_s0 + $0xf8] sm:$0xf0] }
  0x98   : > { %1476 = vmatpush.bf16.msra.mxu2 %v3283_v55  ;;  %1489 = vmatpush.bf16.msra.mxu3 %v3411_v56  ;;  %v4065_v55 = vld [vmem:[%s6252_s0 + $0x2ec] sm:$0xf]  ;;  %v2947_v56 = vor.u32 %v3975_v42, %v2946_v39  ;;  %v3015_v39 = vor.u32 %v3989_v29, %v3012_v30  ;;  %v2996_v42 = vld [vmem:[%s6252_s0 + $0x78] sm:$0xf0] }
  0x9b   : > { %1451 = vmatpush.bf16.msra.mxu0 %v3011_v63  ;;  %1464 = vmatpush.bf16.msra.mxu1 %v3139_v0  ;;  %v3063_v63 = vor.u32 %v4001_v51, %v3060_v52  ;;  %v3191_v0 = vor.u32 %v4033_v53, %v3188_v54  ;;  %v3981_v53 = vld [vmem:[%s6252_s0 + $0x4c] sm:$0xf]  ;;  %v2980_v54 = vld [vmem:[%s6252_s0 + $0x58] sm:$0xf0] }
  0x9c   : > { %1477 = vmatpush.bf16.msra.mxu2 %v3267_v3  ;;  %1490 = vmatpush.bf16.msra.mxu3 %v3395_v4  ;;  %v3319_v3 = vor.u32 %v4065_v55, %v3316_v58  ;;  %v3447_v4 = vor.u32 %v4097_v59, %v3444_v60  ;;  %v3255_v55 = vor.u32 %v4049_v47, %v3252_v48  ;;  %v3108_v58 = vld [vmem:[%s6252_s0 + $0x158] sm:$0xf0]  ;;  %v4045_v59 = vld [vmem:[%s6252_s0 + $0x24c] sm:$0xf] }
  0x9d   : > { %1404 = vmatmul.bf16.vlgmr.msrb.gmra.mxu0 %v4863_v25  ;;  %1417 = vmatmul.bf16.vlgmr.msrb.gmra.mxu1 %v4865_v26  ;;  %v3236_v60 = vld [vmem:[%s6252_s0 + $0x258] sm:$0xf0] }
  0x9e   : > { %1430 = vmatmul.bf16.vlgmr.msrb.gmra.mxu2 %v4867_v27  ;;  %1443 = vmatmul.bf16.vlgmr.msrb.gmra.mxu3 %v4869_v28 }
  0x9f   : > { %1452 = vmatpush.bf16.msra.mxu0 %v2995_v11  ;;  %1465 = vmatpush.bf16.msra.mxu1 %v3123_v12  ;;  %v3047_v11 = vor.u32 %v3997_v1, %v3044_v2  ;;  %v3175_v12 = vor.u32 %v4029_v5, %v3172_v6  ;;  %v3977_v1 = vld [vmem:[%s6252_s0 + $0x2c] sm:$0xf]  ;;  %v2964_v2 = vld [vmem:[%s6252_s0 + $0x38] sm:$0xf0] }
  0xa0   : > { %1478 = vmatpush.bf16.msra.mxu2 %v3251_v15  ;;  %1491 = vmatpush.bf16.msra.mxu3 %v3379_v16  ;;  %v3303_v15 = vor.u32 %v4061_v7, %v3300_v8  ;;  %v3431_v16 = vor.u32 %v4093_v9, %v3428_v10  ;;  %v4009_v5 = vld [vmem:[%s6252_s0 + $0x12c] sm:$0xf]  ;;  %v3092_v6 = vld [vmem:[%s6252_s0 + $0x138] sm:$0xf0] }
  0xa1   : > { %v4041_v7 = vld [vmem:[%s6252_s0 + $0x22c] sm:$0xf]  ;;  %v3220_v8 = vld [vmem:[%s6252_s0 + $0x238] sm:$0xf0] }
  0xa2   : > { %v4073_v9 = vld [vmem:[%s6252_s0 + $0x32c] sm:$0xf]  ;;  %v3348_v10 = vld [vmem:[%s6252_s0 + $0x338] sm:$0xf0] }
  0xa3   : > { %1453 = vmatpush.bf16.msra.mxu0 %v2979_v23  ;;  %1466 = vmatpush.bf16.msra.mxu1 %v3107_v24  ;;  %v3031_v23 = vor.u32 %v3993_v13, %v3028_v14  ;;  %v3159_v24 = vor.u32 %v4025_v17, %v3156_v18  ;;  %v3973_v13 = vld [vmem:[%s6252_s0 + $0xc] sm:$0xf]  ;;  %v2948_v14 = vld [vmem:[%s6252_s0 + $0x18] sm:$0xf0] }
  0xa4   : > { %1479 = vmatpush.bf16.msra.mxu2 %v3235_v31  ;;  %1492 = vmatpush.bf16.msra.mxu3 %v3363_v32  ;;  %v3287_v31 = vor.u32 %v4057_v19, %v3284_v20  ;;  %v3415_v32 = vor.u32 %v4089_v21, %v3412_v22  ;;  %v4005_v17 = vld [vmem:[%s6252_s0 + $0x10c] sm:$0xf]  ;;  %v3076_v18 = vld [vmem:[%s6252_s0 + $0x118] sm:$0xf0] }
  0xa5   : > { %v4037_v19 = vld [vmem:[%s6252_s0 + $0x20c] sm:$0xf]  ;;  %v3204_v20 = vld [vmem:[%s6252_s0 + $0x218] sm:$0xf0] }
  0xa6   : > { %v4069_v21 = vld [vmem:[%s6252_s0 + $0x30c] sm:$0xf]  ;;  %v3332_v22 = vld [vmem:[%s6252_s0 + $0x318] sm:$0xf0]  ;;  %v3207_v29 = vor.u32 %v4037_v19, %v3204_v20 }
  0xa7   : > { %1454 = vmatpush.bf16.msra.mxu0 %v2963_v40  ;;  %1467 = vmatpush.bf16.msra.mxu1 %v3091_v41  ;;  %v3143_v40 = vor.u32 %v4021_v33, %v3140_v34  ;;  %v3985_v41 = vld [vmem:[%s6252_s0 + $0x6c] sm:$0xf]  ;;  %v3335_v30 = vor.u32 %v4069_v21, %v3332_v22  ;;  %v689_v33 = vpop.permute.xlu0 %688 }
  0xa8   : > { %1480 = vmatpush.bf16.msra.mxu2 %v3219_v45  ;;  %1493 = vmatpush.bf16.msra.mxu3 %v3347_v46  ;;  %v4017_v45 = vld [vmem:[%s6252_s0 + $0x16c] sm:$0xf]  ;;  %v3124_v46 = vld [vmem:[%s6252_s0 + $0x178] sm:$0xf0]  ;;  %v2999_v51 = vor.u32 %v3985_v41, %v2996_v42 }
  0xa9   : > { %v3127_v52 = vor.u32 %v4017_v45, %v3124_v46 }
  0xab   : > { %1455 = vmatpush.bf16.msra.mxu0 %v2947_v56  ;;  %1468 = vmatpush.bf16.msra.mxu1 %v3075_v57  ;;  %v3383_v56 = vor.u32 %v4081_v49, %v3380_v50  ;;  %v4013_v57 = vld [vmem:[%s6252_s0 + $0x14c] sm:$0xf] }
  0xac   : > { %1481 = vmatpush.bf16.msra.mxu2 %v3203_v61  ;;  %1494 = vmatpush.bf16.msra.mxu3 %v3331_v62  ;;  %v4077_v61 = vld [vmem:[%s6252_s0 + $0x34c] sm:$0xf]  ;;  %v3364_v62 = vld [vmem:[%s6252_s0 + $0x358] sm:$0xf0] }
  0xae   : > { %1456 = vmatmul.bf16.vlgmr.msra.gmra.mxu0 %v4863_v25  ;;  %1469 = vmatmul.bf16.vlgmr.msra.gmra.mxu1 %v4865_v26 }
  0xaf   : > { %1500 = vmatpush.bf16.msrb.mxu0 %v3063_v63  ;;  %1513 = vmatpush.bf16.msrb.mxu1 %v3191_v0  ;;  %v2983_v63 = vor.u32 %v3981_v53, %v2980_v54  ;;  %v3111_v0 = vor.u32 %v4013_v57, %v3108_v58 }
  0xb0   : > { %1526 = vmatpush.bf16.msrb.mxu2 %v3319_v3  ;;  %1539 = vmatpush.bf16.msrb.mxu3 %v3447_v4  ;;  %v3239_v3 = vor.u32 %v4045_v59, %v3236_v60  ;;  %v3367_v4 = vor.u32 %v4077_v61, %v3364_v62 }
  0xb1   : > { %1482 = vmatmul.bf16.vlgmr.msra.gmra.mxu2 %v4867_v27  ;;  %1495 = vmatmul.bf16.vlgmr.msra.gmra.mxu3 %v4869_v28 }
  0xb3   : > { %1501 = vmatpush.bf16.msrb.mxu0 %v3047_v11  ;;  %1514 = vmatpush.bf16.msrb.mxu1 %v3175_v12  ;;  %v2967_v11 = vor.u32 %v3977_v1, %v2964_v2  ;;  %v3095_v12 = vor.u32 %v4009_v5, %v3092_v6 }
  0xb4   : > { %1527 = vmatpush.bf16.msrb.mxu2 %v3303_v15  ;;  %1540 = vmatpush.bf16.msrb.mxu3 %v3431_v16  ;;  %v3223_v15 = vor.u32 %v4041_v7, %v3220_v8  ;;  %v3351_v16 = vor.u32 %v4073_v9, %v3348_v10 }
  0xb7   : > { %1502 = vmatpush.bf16.msrb.mxu0 %v3031_v23  ;;  %1515 = vmatpush.bf16.msrb.mxu1 %v3159_v24  ;;  %v2951_v23 = vor.u32 %v3973_v13, %v2948_v14  ;;  %v3079_v24 = vor.u32 %v4005_v17, %v3076_v18 }
  0xb8   : > { %1528 = vmatpush.bf16.msrb.mxu2 %v3287_v31  ;;  %1541 = vmatpush.bf16.msrb.mxu3 %v3415_v32  ;;  %v684_v31 = vld [vmem:[%s6231_s1] sm:$0xf] }
  0xb9   : > { %v692_v32 = vperm.slane %v684_v31, 0  ;;  %v694_v60 = vperm.slane %v684_v31, 2  ;;  %v695_v14 = vperm.slane %v684_v31, 3 }
  0xbb   : > { %1503 = vmatpush.bf16.msrb.mxu0 %v3015_v39  ;;  %1516 = vmatpush.bf16.msrb.mxu1 %v3143_v40  ;;  %v700_v34 = vmul.f32 %v692_v32, %v689_v33 }
  0xbc   : > { %1529 = vmatpush.bf16.msrb.mxu2 %v3271_v43  ;;  %1542 = vmatpush.bf16.msrb.mxu3 %v3399_v44 }
  0xbe   : > { %v1556_v42 = vpop.permute.xlu1 %1555 }
  0xbf   : > { %1504 = vmatpush.bf16.msrb.mxu0 %v2999_v51  ;;  %1517 = vmatpush.bf16.msrb.mxu1 %v3127_v52 }
  0xc0   : > { %1530 = vmatpush.bf16.msrb.mxu2 %v3255_v55  ;;  %1543 = vmatpush.bf16.msrb.mxu3 %v3383_v56 }
  0xc3   : > { %1505 = vmatpush.bf16.msrb.mxu0 %v2983_v63  ;;  %1518 = vmatpush.bf16.msrb.mxu1 %v3111_v0  ;;  %v702_v63 = vmul.f32 %v694_v60, %v689_v33 }
  0xc4   : > { %1531 = vmatpush.bf16.msrb.mxu2 %v3239_v3  ;;  %1544 = vmatpush.bf16.msrb.mxu3 %v3367_v4 }
  0xc7   : > { %1506 = vmatpush.bf16.msrb.mxu0 %v2967_v11  ;;  %1519 = vmatpush.bf16.msrb.mxu1 %v3095_v12 }
  0xc8   : > { %1532 = vmatpush.bf16.msrb.mxu2 %v3223_v15  ;;  %1545 = vmatpush.bf16.msrb.mxu3 %v3351_v16  ;;  %v703_v15 = vmul.f32 %v695_v14, %v689_v33 }
  0xcb   : > { %1507 = vmatpush.bf16.msrb.mxu0 %v2951_v23  ;;  %1520 = vmatpush.bf16.msrb.mxu1 %v3079_v24 }
  0xcc   : > { %1533 = vmatpush.bf16.msrb.mxu2 %v3207_v29  ;;  %1546 = vmatpush.bf16.msrb.mxu3 %v3335_v30 }
  0xce   : > { %1508 = vmatmul.bf16.vlgmr.msrb.gmra.mxu0 %v4863_v25  ;;  %1521 = vmatmul.bf16.vlgmr.msrb.gmra.mxu1 %v4865_v26 }
  0xcf   : > { %1534 = vmatmul.bf16.vlgmr.msrb.gmra.mxu2 %v4867_v27  ;;  %1547 = vmatmul.bf16.vlgmr.msrb.gmra.mxu3 %v4869_v28  ;;  %v693_v28 = vperm.slane %v684_v31, 1 }
  0xd1   : > { %v701_v47 = vmul.f32 %v693_v28, %v689_v33 }
 0x10a   : > { %v1353_v35 = vpop.f32.mrf.mxu0  ;;  %v1366_v36 = vpop.f32.mrf.mxu1 }
 0x10b   : > { %v1354_v37 = vadd.f32 %v1353_v35, %v700_v34 }
 0x10d   : > { %v1367_v38 = vadd.f32 %v1366_v36, %v1354_v37 }
 0x111   : > { %v1379_v39 = vpop.f32.mrf.mxu2  ;;  %v1392_v40 = vpop.f32.mrf.mxu3 }
 0x112   : > { %v1380_v25 = vadd.f32 %v1379_v39, %v1367_v38  ;;  %v1355_v41 = vpop.f32.mrf.mxu0  ;;  %v1368_v26 = vpop.f32.mrf.mxu1 }
 0x114   : > { %v1393_v27 = vadd.f32 %v1392_v40, %v1380_v25 }
 0x116   : > { %v1558_v43 = vadd.f32 %v1556_v42, %v1393_v27 }
 0x118   : > { %v1562_v44 = vmax.f32 %v1558_v43, 0.0 }
 0x119   : > { %v1381_v45 = vpop.f32.mrf.mxu2  ;;  %v1394_v46 = vpop.f32.mrf.mxu3 }
 0x11a   : > { %1568 = vst [vmem:[#allocation2 + $0x10] sm:$0xff] %v1562_v44  ;;  %v1405_v48 = vpop.f32.mrf.mxu0  ;;  %v1418_v49 = vpop.f32.mrf.mxu1 }
 0x11b   : > { %v1406_v50 = vadd.f32 %v1405_v48, %v701_v47 }
 0x11d   : > { %v1419_v51 = vadd.f32 %v1418_v49, %v1406_v50 }
 0x121   : > { %v1431_v52 = vpop.f32.mrf.mxu2  ;;  %v1444_v53 = vpop.f32.mrf.mxu3 }
 0x122   : > { %v1432_v54 = vadd.f32 %v1431_v52, %v1419_v51  ;;  %v1407_v55 = vpop.f32.mrf.mxu0  ;;  %v1420_v56 = vpop.f32.mrf.mxu1 }
 0x124   : > { %v1445_v57 = vadd.f32 %v1444_v53, %v1432_v54 }
 0x126   : > { %v1559_v58 = vadd.f32 %v1556_v42, %v1445_v57 }
 0x128   : > { %v1563_v59 = vmax.f32 %v1559_v58, 0.0 }
 0x129   : > { %v1433_v61 = vpop.f32.mrf.mxu2  ;;  %v1446_v62 = vpop.f32.mrf.mxu3 }
 0x12a   : > { %1569 = vst [vmem:[#allocation2] sm:$0xff] %v1563_v59 }
 0x12b   : > { %v1457_v0 = vpop.f32.mrf.mxu0  ;;  %v1470_v1 = vpop.f32.mrf.mxu1 }
 0x12c   : > { %v1458_v2 = vadd.f32 %v1457_v0, %v702_v63 }
 0x12e   : > { %v1471_v3 = vadd.f32 %v1470_v1, %v1458_v2 }
 0x133   : > { %v1459_v7 = vpop.f32.mrf.mxu0  ;;  %v1472_v8 = vpop.f32.mrf.mxu1 }
 0x134   : > { %v1483_v4 = vpop.f32.mrf.mxu2  ;;  %v1496_v5 = vpop.f32.mrf.mxu3 }
 0x135   : > { %v1484_v6 = vadd.f32 %v1483_v4, %v1471_v3 }
 0x137   : > { %v1497_v9 = vadd.f32 %v1496_v5, %v1484_v6 }
 0x139   : > { %v1560_v10 = vadd.f32 %v1556_v42, %v1497_v9 }
 0x13b   : > { %v1564_v11 = vmax.f32 %v1560_v10, 0.0 }
 0x13c   : > { %v1485_v12 = vpop.f32.mrf.mxu2  ;;  %v1498_v13 = vpop.f32.mrf.mxu3 }
 0x13d   : > { %1570 = vst [vmem:[#allocation2 + $0x18] sm:$0xff] %v1564_v11 }
 0x14b   : > { %v1509_v16 = vpop.f32.mrf.mxu0  ;;  %v1522_v17 = vpop.f32.mrf.mxu1 }
 0x14c   : > { %v1510_v18 = vadd.f32 %v1509_v16, %v703_v15 }
 0x14e   : > { %v1523_v19 = vadd.f32 %v1522_v17, %v1510_v18 }
 0x152   : > { %v1535_v20 = vpop.f32.mrf.mxu2  ;;  %v1548_v21 = vpop.f32.mrf.mxu3 }
 0x153   : > { %v1536_v22 = vadd.f32 %v1535_v20, %v1523_v19  ;;  %v1511_v23 = vpop.f32.mrf.mxu0  ;;  %v1524_v24 = vpop.f32.mrf.mxu1 }
 0x155   : > { %v1549_v29 = vadd.f32 %v1548_v21, %v1536_v22 }
 0x157   : > { %v1561_v30 = vadd.f32 %v1556_v42, %v1549_v29 }
 0x159   : > { %v1565_v32 = vmax.f32 %v1561_v30, 0.0 }
 0x15a   : > { %v1537_v34 = vpop.f32.mrf.mxu2  ;;  %v1550_v35 = vpop.f32.mrf.mxu3 }
 0x15b   : > { %1571 = vst [vmem:[#allocation2 + $0x8] sm:$0xff] %v1565_v32 }
 0x15c PF: > { %p1572_p5 = scmp.eq.s32.totalorder %s4320_s23, 1  ;;  %p3448_p6 = scmp.ne.s32.totalorder %s4320_s23, 1 }
 0x15d   : > { %s6253_s22 = sld [smem:[#allocation9_spill]] (!%p3448_p6) }
 0x15e   : > { %1575 = sbr.rel (%p3448_p6) target bundleno = 646 (0x286), region = 92 }
 0x163   : > { %v3563_v31 = vld [vmem:[%s6253_s22 + $0xe0] sm:$0xf]  ;;  %v4130_v33 = vld [vmem:[%s6253_s22 + $0xec] sm:$0xf0]  ;;  %vm2634_vm0 = vcmask 1040384   ;;  %vm2636_vm1 = vcmask 1042434  }
 0x164   : > { %v3691_v36 = vld [vmem:[%s6253_s22 + $0x1e0] sm:$0xf]  ;;  %v3564_v37 = vor.u32 %v4130_v33, %v3563_v31  ;;  %v4162_v38 = vld [vmem:[%s6253_s22 + $0x1ec] sm:$0xf0]  ;;  %vm2638_vm2 = vcmask 1041408  }
 0x165   : > { %v3819_v39 = vld [vmem:[%s6253_s22 + $0x2e0] sm:$0xf]  ;;  %v4194_v40 = vld [vmem:[%s6253_s22 + $0x2ec] sm:$0xf0]  ;;  %v3692_v25 = vor.u32 %v4162_v38, %v3691_v36 }
 0x166   : > { %v3820_v41 = vor.u32 %v4194_v40, %v3819_v39  ;;  %v3947_v26 = vld [vmem:[%s6253_s22 + $0x3e0] sm:$0xf]  ;;  %v4226_v42 = vld [vmem:[%s6253_s22 + $0x3ec] sm:$0xf0]  ;;  %2352 = vmatpush.bf16.msra.mxu0 %v3564_v37 }
 0x167   : > { %v3547_v27 = vld [vmem:[%s6253_s22 + $0xc0] sm:$0xf]  ;;  %v3948_v43 = vor.u32 %v4226_v42, %v3947_v26  ;;  %v4126_v28 = vld [vmem:[%s6253_s22 + $0xcc] sm:$0xf0]  ;;  %2365 = vmatpush.bf16.msra.mxu1 %v3692_v25 }
 0x168   : > { %v3675_v44 = vld [vmem:[%s6253_s22 + $0x1c0] sm:$0xf]  ;;  %v4158_v45 = vld [vmem:[%s6253_s22 + $0x1cc] sm:$0xf0]  ;;  %2378 = vmatpush.bf16.msra.mxu2 %v3820_v41  ;;  %v3548_v46 = vor.u32 %v4126_v28, %v3547_v27 }
 0x169   : > { %v3676_v47 = vor.u32 %v4158_v45, %v3675_v44  ;;  %v3803_v48 = vld [vmem:[%s6253_s22 + $0x2c0] sm:$0xf]  ;;  %v4190_v49 = vld [vmem:[%s6253_s22 + $0x2cc] sm:$0xf0]  ;;  %2391 = vmatpush.bf16.msra.mxu3 %v3948_v43 }
 0x16a   : > { %v3931_v50 = vld [vmem:[%s6253_s22 + $0x3c0] sm:$0xf]  ;;  %v3804_v51 = vor.u32 %v4190_v49, %v3803_v48  ;;  %v4222_v52 = vld [vmem:[%s6253_s22 + $0x3cc] sm:$0xf0]  ;;  %2353 = vmatpush.bf16.msra.mxu0 %v3548_v46 }
 0x16b   : > { %v3531_v53 = vld [vmem:[%s6253_s22 + $0xa0] sm:$0xf]  ;;  %v4122_v54 = vld [vmem:[%s6253_s22 + $0xac] sm:$0xf0]  ;;  %v3932_v55 = vor.u32 %v4222_v52, %v3931_v50  ;;  %2366 = vmatpush.bf16.msra.mxu1 %v3676_v47 }
 0x16c   : > { %v3659_v56 = vld [vmem:[%s6253_s22 + $0x1a0] sm:$0xf]  ;;  %v4154_v57 = vld [vmem:[%s6253_s22 + $0x1ac] sm:$0xf0]  ;;  %v3532_v59 = vor.u32 %v4122_v54, %v3531_v53  ;;  %2379 = vmatpush.bf16.msra.mxu2 %v3804_v51 }
 0x16d   : > { %v3787_v58 = vld [vmem:[%s6253_s22 + $0x2a0] sm:$0xf]  ;;  %v4186_v60 = vld [vmem:[%s6253_s22 + $0x2ac] sm:$0xf0]  ;;  %v3660_v63 = vor.u32 %v4154_v57, %v3659_v56  ;;  %2392 = vmatpush.bf16.msra.mxu3 %v3932_v55 }
 0x16e   : > { %v3915_v61 = vld [vmem:[%s6253_s22 + $0x3a0] sm:$0xf]  ;;  %v4218_v62 = vld [vmem:[%s6253_s22 + $0x3ac] sm:$0xf0]  ;;  %v3788_v0 = vor.u32 %v4186_v60, %v3787_v58  ;;  %2354 = vmatpush.bf16.msra.mxu0 %v3532_v59  ;;  %v4128_v58 = vld [vmem:[%s6253_s22 + $0xe4] sm:$0xf] }
 0x16f   : > { %v3515_v1 = vld [vmem:[%s6253_s22 + $0x80] sm:$0xf]  ;;  %v4118_v2 = vld [vmem:[%s6253_s22 + $0x8c] sm:$0xf0]  ;;  %v3916_v4 = vor.u32 %v4218_v62, %v3915_v61  ;;  %2367 = vmatpush.bf16.msra.mxu1 %v3660_v63  ;;  %v3565_v59 = vld [vmem:[%s6253_s22 + $0xf0] sm:$0xf0] }
 0x170   : > { %v3643_v3 = vld [vmem:[%s6253_s22 + $0x180] sm:$0xf]  ;;  %v4150_v5 = vld [vmem:[%s6253_s22 + $0x18c] sm:$0xf0]  ;;  %v3516_v10 = vor.u32 %v4118_v2, %v3515_v1  ;;  %2380 = vmatpush.bf16.msra.mxu2 %v3788_v0  ;;  %v4160_v60 = vld [vmem:[%s6253_s22 + $0x1e4] sm:$0xf] }
 0x171   : > { %v3771_v6 = vld [vmem:[%s6253_s22 + $0x280] sm:$0xf]  ;;  %v4182_v7 = vld [vmem:[%s6253_s22 + $0x28c] sm:$0xf0]  ;;  %v3644_v11 = vor.u32 %v4150_v5, %v3643_v3  ;;  %2393 = vmatpush.bf16.msra.mxu3 %v3916_v4  ;;  %v3693_v62 = vld [vmem:[%s6253_s22 + $0x1f0] sm:$0xf0] }
 0x172   : > { %v3899_v8 = vld [vmem:[%s6253_s22 + $0x380] sm:$0xf]  ;;  %v4214_v9 = vld [vmem:[%s6253_s22 + $0x38c] sm:$0xf0]  ;;  %v3772_v12 = vor.u32 %v4182_v7, %v3771_v6  ;;  %2355 = vmatpush.bf16.msra.mxu0 %v3516_v10  ;;  %v4192_v63 = vld [vmem:[%s6253_s22 + $0x2e4] sm:$0xf]  ;;  %v3568_v6 = vor.u32 %v4128_v58, %v3565_v59  ;;  %v3696_v7 = vor.u32 %v4160_v60, %v3693_v62 }
 0x173   : > { %v3499_v13 = vld [vmem:[%s6253_s22 + $0x60] sm:$0xf]  ;;  %v4114_v14 = vld [vmem:[%s6253_s22 + $0x6c] sm:$0xf0]  ;;  %v3900_v16 = vor.u32 %v4214_v9, %v3899_v8  ;;  %2368 = vmatpush.bf16.msra.mxu1 %v3644_v11  ;;  %v3821_v0 = vld [vmem:[%s6253_s22 + $0x2f0] sm:$0xf0] }
 0x174   : > { %v3627_v15 = vld [vmem:[%s6253_s22 + $0x160] sm:$0xf]  ;;  %v4146_v17 = vld [vmem:[%s6253_s22 + $0x16c] sm:$0xf0]  ;;  %v3500_v22 = vor.u32 %v4114_v14, %v3499_v13  ;;  %2381 = vmatpush.bf16.msra.mxu2 %v3772_v12  ;;  %v4224_v3 = vld [vmem:[%s6253_s22 + $0x3e4] sm:$0xf]  ;;  %v3824_v8 = vor.u32 %v4192_v63, %v3821_v0 }
 0x175   : > { %v3755_v18 = vld [vmem:[%s6253_s22 + $0x260] sm:$0xf]  ;;  %v4178_v19 = vld [vmem:[%s6253_s22 + $0x26c] sm:$0xf0]  ;;  %v3628_v23 = vor.u32 %v4146_v17, %v3627_v15  ;;  %2394 = vmatpush.bf16.msra.mxu3 %v3900_v16  ;;  %v3949_v4 = vld [vmem:[%s6253_s22 + $0x3f0] sm:$0xf0] }
 0x176   : > { %v3883_v20 = vld [vmem:[%s6253_s22 + $0x360] sm:$0xf]  ;;  %v4210_v21 = vld [vmem:[%s6253_s22 + $0x36c] sm:$0xf0]  ;;  %v3756_v24 = vor.u32 %v4178_v19, %v3755_v18  ;;  %2356 = vmatpush.bf16.msra.mxu0 %v3500_v22  ;;  %v4124_v9 = vld [vmem:[%s6253_s22 + $0xc4] sm:$0xf]  ;;  %v3952_v12 = vor.u32 %v4224_v3, %v3949_v4 }
 0x177   : > { %v3483_v29 = vld [vmem:[%s6253_s22 + $0x40] sm:$0xf]  ;;  %v4110_v30 = vld [vmem:[%s6253_s22 + $0x4c] sm:$0xf0]  ;;  %v3884_v34 = vor.u32 %v4210_v21, %v3883_v20  ;;  %2369 = vmatpush.bf16.msra.mxu1 %v3628_v23  ;;  %v3549_v10 = vld [vmem:[%s6253_s22 + $0xd0] sm:$0xf0] }
 0x178   : > { %v3611_v32 = vld [vmem:[%s6253_s22 + $0x140] sm:$0xf]  ;;  %v4142_v35 = vld [vmem:[%s6253_s22 + $0x14c] sm:$0xf0]  ;;  %v3484_v38 = vor.u32 %v4110_v30, %v3483_v29  ;;  %2382 = vmatpush.bf16.msra.mxu2 %v3756_v24  ;;  %v4156_v11 = vld [vmem:[%s6253_s22 + $0x1c4] sm:$0xf]  ;;  %v3552_v19 = vor.u32 %v4124_v9, %v3549_v10 }
 0x179   : > { %v3739_v31 = vld [vmem:[%s6253_s22 + $0x240] sm:$0xf]  ;;  %v4174_v33 = vld [vmem:[%s6253_s22 + $0x24c] sm:$0xf0]  ;;  %v3612_v39 = vor.u32 %v4142_v35, %v3611_v32  ;;  %2395 = vmatpush.bf16.msra.mxu3 %v3884_v34  ;;  %v3677_v13 = vld [vmem:[%s6253_s22 + $0x1d0] sm:$0xf0] }
 0x17a   : > { %v3867_v36 = vld [vmem:[%s6253_s22 + $0x340] sm:$0xf]  ;;  %v4206_v37 = vld [vmem:[%s6253_s22 + $0x34c] sm:$0xf0]  ;;  %v3740_v40 = vor.u32 %v4174_v33, %v3739_v31  ;;  %2357 = vmatpush.bf16.msra.mxu0 %v3484_v38  ;;  %v4188_v14 = vld [vmem:[%s6253_s22 + $0x2c4] sm:$0xf]  ;;  %v3680_v24 = vor.u32 %v4156_v11, %v3677_v13 }
 0x17b   : > { %v3467_v25 = vld [vmem:[%s6253_s22 + $0x20] sm:$0xf]  ;;  %v4106_v41 = vld [vmem:[%s6253_s22 + $0x2c] sm:$0xf0]  ;;  %v3868_v42 = vor.u32 %v4206_v37, %v3867_v36  ;;  %2370 = vmatpush.bf16.msra.mxu1 %v3612_v39  ;;  %v3805_v15 = vld [vmem:[%s6253_s22 + $0x2d0] sm:$0xf0] }
 0x17c   : > { %v3595_v26 = vld [vmem:[%s6253_s22 + $0x120] sm:$0xf]  ;;  %v4138_v27 = vld [vmem:[%s6253_s22 + $0x12c] sm:$0xf0]  ;;  %v3468_v46 = vor.u32 %v4106_v41, %v3467_v25  ;;  %2383 = vmatpush.bf16.msra.mxu2 %v3740_v40  ;;  %v4220_v16 = vld [vmem:[%s6253_s22 + $0x3c4] sm:$0xf]  ;;  %v3808_v29 = vor.u32 %v4188_v14, %v3805_v15 }
 0x17d   : > { %v3723_v43 = vld [vmem:[%s6253_s22 + $0x220] sm:$0xf]  ;;  %v4170_v28 = vld [vmem:[%s6253_s22 + $0x22c] sm:$0xf0]  ;;  %v3596_v49 = vor.u32 %v4138_v27, %v3595_v26  ;;  %2396 = vmatpush.bf16.msra.mxu3 %v3868_v42  ;;  %v3933_v17 = vld [vmem:[%s6253_s22 + $0x3d0] sm:$0xf0] }
 0x17e   : > { %v3851_v44 = vld [vmem:[%s6253_s22 + $0x320] sm:$0xf]  ;;  %v4202_v45 = vld [vmem:[%s6253_s22 + $0x32c] sm:$0xf0]  ;;  %v3724_v50 = vor.u32 %v4170_v28, %v3723_v43  ;;  %2358 = vmatpush.bf16.msra.mxu0 %v3468_v46  ;;  %v4120_v20 = vld [vmem:[%s6253_s22 + $0xa4] sm:$0xf]  ;;  %v3936_v35 = vor.u32 %v4220_v16, %v3933_v17 }
 0x17f   : > { %v3451_v47 = vld [vmem:[%s6253_s22] sm:$0xf]  ;;  %v4102_v48 = vld [vmem:[%s6253_s22 + $0xc] sm:$0xf0]  ;;  %v3852_v54 = vor.u32 %v4202_v45, %v3851_v44  ;;  %2371 = vmatpush.bf16.msra.mxu1 %v3596_v49  ;;  %v3533_v21 = vld [vmem:[%s6253_s22 + $0xb0] sm:$0xf0] }
 0x180   : > { %v3579_v51 = vld [vmem:[%s6253_s22 + $0x100] sm:$0xf]  ;;  %v4134_v52 = vld [vmem:[%s6253_s22 + $0x10c] sm:$0xf0]  ;;  %v3452_v61 = vor.u32 %v4102_v48, %v3451_v47  ;;  %2384 = vmatpush.bf16.msra.mxu2 %v3724_v50  ;;  %v4152_v22 = vld [vmem:[%s6253_s22 + $0x1a4] sm:$0xf]  ;;  %v3536_v41 = vor.u32 %v4120_v20, %v3533_v21 }
 0x181   : > { %v3707_v53 = vld [vmem:[%s6253_s22 + $0x200] sm:$0xf]  ;;  %v4166_v55 = vld [vmem:[%s6253_s22 + $0x20c] sm:$0xf0]  ;;  %v3580_v1 = vor.u32 %v4134_v52, %v3579_v51  ;;  %2397 = vmatpush.bf16.msra.mxu3 %v3852_v54  ;;  %v3661_v30 = vld [vmem:[%s6253_s22 + $0x1b0] sm:$0xf0] }
 0x182   : > { %v3835_v56 = vld [vmem:[%s6253_s22 + $0x300] sm:$0xf]  ;;  %v4198_v57 = vld [vmem:[%s6253_s22 + $0x30c] sm:$0xf0]  ;;  %v3708_v2 = vor.u32 %v4166_v55, %v3707_v53  ;;  %2359 = vmatpush.bf16.msra.mxu0 %v3452_v61  ;;  %v4184_v32 = vld [vmem:[%s6253_s22 + $0x2a4] sm:$0xf]  ;;  %v3664_v26 = vor.u32 %v4152_v22, %v3661_v30 }
 0x183   : > { %v3836_v5 = vor.u32 %v4198_v57, %v3835_v56  ;;  %2372 = vmatpush.bf16.msra.mxu1 %v3580_v1  ;;  %v5492_v18 = vld [vmem:[#allocation2 + $0x18] sm:$0xff]  ;;  %v3789_v34 = vld [vmem:[%s6253_s22 + $0x2b0] sm:$0xf0]  ;;  %v5519_v33 = vld [vmem:[#allocation2 + $0x10] sm:$0xff]  ;;  %v4331_v22 = vmov 0  }
 0x184   : > { %2385 = vmatpush.bf16.msra.mxu2 %v3708_v2  ;;  %v5505_v23 = vpack.c.bf16 %v5492_v18, %v5492_v18  ;;  %v5517_v31 = vld [vmem:[#allocation2 + $0x8] sm:$0xff]  ;;  %v5521_v36 = vld [vmem:[#allocation2] sm:$0xff]  ;;  %v4216_v37 = vld [vmem:[%s6253_s22 + $0x3a4] sm:$0xf]  ;;  %v5535_v40 = vpack.c.bf16 %v5519_v33, %v5519_v33  ;;  %v3792_v42 = vor.u32 %v4184_v32, %v3789_v34  ;;  %4264 = vset.pattern.permute.xlu0 %v4331_v22 }
 0x185   : > { %2398 = vmatpush.bf16.msra.mxu3 %v3836_v5  ;;  %v3917_v38 = vld [vmem:[%s6253_s22 + $0x3b0] sm:$0xf0]  ;;  %v5531_v39 = vpack.c.bf16 %v5517_v31, %v5517_v31  ;;  %v5539_v25 = vpack.c.bf16 %v5521_v36, %v5521_v36  ;;  %v4116_v27 = vld [vmem:[%s6253_s22 + $0x84] sm:$0xf]  ;;  %4265 = vset.pattern.permute.xlu1 %v4331_v22  ;;  %v3523_v22 = vld [vmem:[%s6253_s22 + $0x88] sm:$0xf] }
 0x186   : > { %2404 = vmatpush.bf16.msrb.mxu0 %v3568_v6  ;;  %v3517_v43 = vld [vmem:[%s6253_s22 + $0x90] sm:$0xf0]  ;;  %v4148_v28 = vld [vmem:[%s6253_s22 + $0x184] sm:$0xf]  ;;  %v3920_v44 = vor.u32 %v4216_v37, %v3917_v38 }
 0x187   : > { %2417 = vmatpush.bf16.msrb.mxu1 %v3696_v7  ;;  %2386 = vmatmul.bf16.vlgmr.msra.gmra.mxu2 %v5505_v23  ;;  %v3645_v45 = vld [vmem:[%s6253_s22 + $0x190] sm:$0xf0]  ;;  %v4180_v46 = vld [vmem:[%s6253_s22 + $0x284] sm:$0xf]  ;;  %v3520_v50 = vor.u32 %v4116_v27, %v3517_v43 }
 0x188   : > { %2430 = vmatpush.bf16.msrb.mxu2 %v3824_v8  ;;  %v3773_v47 = vld [vmem:[%s6253_s22 + $0x290] sm:$0xf0]  ;;  %2360 = vmatmul.bf16.vlgmr.msra.gmra.mxu0 %v5535_v40  ;;  %v4212_v48 = vld [vmem:[%s6253_s22 + $0x384] sm:$0xf]  ;;  %v3648_v51 = vor.u32 %v4148_v28, %v3645_v45  ;;  %v4131_v45 = vld [vmem:[%s6253_s22 + $0xf4] sm:$0xf0] }
 0x189   : > { %2443 = vmatpush.bf16.msrb.mxu3 %v3952_v12  ;;  %v3901_v49 = vld [vmem:[%s6253_s22 + $0x390] sm:$0xf0]  ;;  %2373 = vmatmul.bf16.vlgmr.msra.gmra.mxu1 %v5539_v25  ;;  %v3776_v52 = vor.u32 %v4180_v46, %v3773_v47  ;;  %v4112_v53 = vld [vmem:[%s6253_s22 + $0x64] sm:$0xf]  ;;  %v3699_v46 = vld [vmem:[%s6253_s22 + $0x1e8] sm:$0xf] }
 0x18a   : > { %2405 = vmatpush.bf16.msrb.mxu0 %v3552_v19  ;;  %2399 = vmatmul.bf16.vlgmr.msra.gmra.mxu3 %v5531_v39  ;;  %v3501_v54 = vld [vmem:[%s6253_s22 + $0x70] sm:$0xf0]  ;;  %v4144_v55 = vld [vmem:[%s6253_s22 + $0x164] sm:$0xf]  ;;  %v3904_v56 = vor.u32 %v4212_v48, %v3901_v49  ;;  %v4163_v47 = vld [vmem:[%s6253_s22 + $0x1f4] sm:$0xf0] }
 0x18b   : > { %2418 = vmatpush.bf16.msrb.mxu1 %v3680_v24  ;;  %v3629_v57 = vld [vmem:[%s6253_s22 + $0x170] sm:$0xf0]  ;;  %v4176_v58 = vld [vmem:[%s6253_s22 + $0x264] sm:$0xf]  ;;  %v3504_v62 = vor.u32 %v4112_v53, %v3501_v54  ;;  %v3827_v49 = vld [vmem:[%s6253_s22 + $0x2e8] sm:$0xf] }
 0x18c   : > { %2431 = vmatpush.bf16.msrb.mxu2 %v3808_v29  ;;  %v3757_v59 = vld [vmem:[%s6253_s22 + $0x270] sm:$0xf0]  ;;  %v4208_v60 = vld [vmem:[%s6253_s22 + $0x364] sm:$0xf]  ;;  %v3632_v63 = vor.u32 %v4144_v55, %v3629_v57  ;;  %v3955_v54 = vld [vmem:[%s6253_s22 + $0x3e8] sm:$0xf] }
 0x18d   : > { %2444 = vmatpush.bf16.msrb.mxu3 %v3936_v35  ;;  %v3885_v61 = vld [vmem:[%s6253_s22 + $0x370] sm:$0xf0]  ;;  %v3760_v0 = vor.u32 %v4176_v58, %v3757_v59  ;;  %v4108_v1 = vld [vmem:[%s6253_s22 + $0x44] sm:$0xf]  ;;  %v4227_v55 = vld [vmem:[%s6253_s22 + $0x3f4] sm:$0xf0]  ;;  %v3700_v58 = vor.u32 %v4163_v47, %v3699_v46 }
 0x18e   : > { %2406 = vmatpush.bf16.msrb.mxu0 %v3536_v41  ;;  %v3485_v2 = vld [vmem:[%s6253_s22 + $0x50] sm:$0xf0]  ;;  %v4140_v3 = vld [vmem:[%s6253_s22 + $0x144] sm:$0xf]  ;;  %v3888_v4 = vor.u32 %v4208_v60, %v3885_v61  ;;  %v3555_v60 = vld [vmem:[%s6253_s22 + $0xc8] sm:$0xf] }
 0x18f   : > { %2419 = vmatpush.bf16.msrb.mxu1 %v3664_v26  ;;  %v3613_v5 = vld [vmem:[%s6253_s22 + $0x150] sm:$0xf0]  ;;  %v4172_v6 = vld [vmem:[%s6253_s22 + $0x244] sm:$0xf]  ;;  %v3488_v10 = vor.u32 %v4108_v1, %v3485_v2  ;;  %v4127_v61 = vld [vmem:[%s6253_s22 + $0xd4] sm:$0xf0] }
 0x190   : > { %2432 = vmatpush.bf16.msrb.mxu2 %v3792_v42  ;;  %v3741_v7 = vld [vmem:[%s6253_s22 + $0x250] sm:$0xf0]  ;;  %v4204_v8 = vld [vmem:[%s6253_s22 + $0x344] sm:$0xf]  ;;  %v3616_v12 = vor.u32 %v4140_v3, %v3613_v5  ;;  %v3811_v1 = vld [vmem:[%s6253_s22 + $0x2c8] sm:$0xf]  ;;  %v3556_v5 = vor.u32 %v4127_v61, %v3555_v60 }
 0x191   : > { %2445 = vmatpush.bf16.msrb.mxu3 %v3920_v44  ;;  %v3869_v9 = vld [vmem:[%s6253_s22 + $0x350] sm:$0xf0]  ;;  %v2568_v11 = vld [vmem:[%s6235_s5] sm:$0xff]  ;;  %v3744_v13 = vor.u32 %v4172_v6, %v3741_v7  ;;  %v3571_v44 = vld [vmem:[%s6253_s22 + $0xe8] sm:$0xf] }
 0x192   : > { %2407 = vmatpush.bf16.msrb.mxu0 %v3520_v50  ;;  %v4104_v14 = vld [vmem:[%s6253_s22 + $0x24] sm:$0xf]  ;;  %v3469_v15 = vld [vmem:[%s6253_s22 + $0x30] sm:$0xf0]  ;;  %v3872_v17 = vor.u32 %v4204_v8, %v3869_v9  ;;  %2571 = vperm.xlu0 %4264, %v2568_v11   ;;  %v4195_v50 = vld [vmem:[%s6253_s22 + $0x2f4] sm:$0xf0]  ;;  %v3572_v57 = vor.u32 %v4131_v45, %v3571_v44 }
 0x193   : > { %2420 = vmatpush.bf16.msrb.mxu1 %v3648_v51  ;;  %v4136_v16 = vld [vmem:[%s6253_s22 + $0x124] sm:$0xf]  ;;  %v3597_v19 = vld [vmem:[%s6253_s22 + $0x130] sm:$0xf0]  ;;  %v3472_v30 = vor.u32 %v4104_v14, %v3469_v15  ;;  %v3828_v59 = vor.u32 %v4195_v50, %v3827_v49  ;;  %v4191_v2 = vld [vmem:[%s6253_s22 + $0x2d4] sm:$0xf0] }
 0x194   : > { %2433 = vmatpush.bf16.msrb.mxu2 %v3776_v52  ;;  %v4168_v20 = vld [vmem:[%s6253_s22 + $0x224] sm:$0xf]  ;;  %v3725_v21 = vld [vmem:[%s6253_s22 + $0x230] sm:$0xf0]  ;;  %v3600_v37 = vor.u32 %v4136_v16, %v3597_v19  ;;  %v3939_v3 = vld [vmem:[%s6253_s22 + $0x3c8] sm:$0xf]  ;;  %v3812_v7 = vor.u32 %v4191_v2, %v3811_v1 }
 0x195   : > { %2446 = vmatpush.bf16.msrb.mxu3 %v3904_v56  ;;  %v4200_v24 = vld [vmem:[%s6253_s22 + $0x324] sm:$0xf]  ;;  %v3853_v29 = vld [vmem:[%s6253_s22 + $0x330] sm:$0xf0]  ;;  %v3728_v38 = vor.u32 %v4168_v20, %v3725_v21  ;;  %v3539_v8 = vld [vmem:[%s6253_s22 + $0xa8] sm:$0xf] }
 0x196   : > { %2408 = vmatpush.bf16.msrb.mxu0 %v3504_v62  ;;  %v4100_v32 = vld [vmem:[%s6253_s22 + $0x4] sm:$0xf]  ;;  %v3453_v34 = vld [vmem:[%s6253_s22 + $0x10] sm:$0xf0]  ;;  %v3856_v27 = vor.u32 %v4200_v24, %v3853_v29  ;;  %v3683_v62 = vld [vmem:[%s6253_s22 + $0x1c8] sm:$0xf] }
 0x197   : > { %2421 = vmatpush.bf16.msrb.mxu1 %v3632_v63  ;;  %v4132_v35 = vld [vmem:[%s6253_s22 + $0x104] sm:$0xf]  ;;  %v3581_v41 = vld [vmem:[%s6253_s22 + $0x110] sm:$0xf0]  ;;  %v3456_v48 = vor.u32 %v4100_v32, %v3453_v34  ;;  %v3956_v63 = vor.u32 %v4227_v55, %v3955_v54  ;;  %v4123_v9 = vld [vmem:[%s6253_s22 + $0xb4] sm:$0xf0] }
 0x198   : > { %2434 = vmatpush.bf16.msrb.mxu2 %v3760_v0  ;;  %v4164_v26 = vld [vmem:[%s6253_s22 + $0x204] sm:$0xf]  ;;  %v3709_v42 = vld [vmem:[%s6253_s22 + $0x210] sm:$0xf0]  ;;  %v3584_v52 = vor.u32 %v4132_v35, %v3581_v41  ;;  %v4159_v0 = vld [vmem:[%s6253_s22 + $0x1d4] sm:$0xf0]  ;;  %v3540_v19 = vor.u32 %v4123_v9, %v3539_v8 }
 0x199   : > { %2447 = vmatpush.bf16.msrb.mxu3 %v3888_v4  ;;  %v4196_v43 = vld [vmem:[%s6253_s22 + $0x304] sm:$0xf]  ;;  %v3837_v28 = vld [vmem:[%s6253_s22 + $0x310] sm:$0xf0]  ;;  %v3712_v53 = vor.u32 %v4164_v26, %v3709_v42  ;;  %v4223_v4 = vld [vmem:[%s6253_s22 + $0x3d4] sm:$0xf0]  ;;  %v3684_v6 = vor.u32 %v4159_v0, %v3683_v62 }
 0x19a   : > { %2409 = vmatpush.bf16.msrb.mxu0 %v3488_v10  ;;  %v2578_v51 = vld [vmem:[%s6236_s6] sm:$0xff]  ;;  %v3840_v56 = vor.u32 %v4196_v43, %v3837_v28  ;;  %v3667_v10 = vld [vmem:[%s6253_s22 + $0x1a8] sm:$0xf]  ;;  %v3940_v11 = vor.u32 %v4223_v4, %v3939_v3  ;;  %v4187_v14 = vld [vmem:[%s6253_s22 + $0x2b4] sm:$0xf0] }
 0x19b   : > { %2422 = vmatpush.bf16.msrb.mxu1 %v3616_v12  ;;  %2581 = vperm.xlu0 %4264, %v2578_v51   ;;  %v4155_v12 = vld [vmem:[%s6253_s22 + $0x1b4] sm:$0xf0]  ;;  %v3923_v15 = vld [vmem:[%s6253_s22 + $0x3a8] sm:$0xf] }
 0x19c   : > { %2435 = vmatpush.bf16.msrb.mxu2 %v3744_v13  ;;  %v3795_v13 = vld [vmem:[%s6253_s22 + $0x2a8] sm:$0xf]  ;;  %v4219_v16 = vld [vmem:[%s6253_s22 + $0x3b4] sm:$0xf0]  ;;  %v3668_v20 = vor.u32 %v4155_v12, %v3667_v10 }
 0x19d   : > { %2448 = vmatpush.bf16.msrb.mxu3 %v3872_v17  ;;  %v2616_v17 = vld [vmem:[#allocation5] sm:$0x1]  ;;  %v3796_v21 = vor.u32 %v4187_v14, %v3795_v13  ;;  %v4119_v24 = vld [vmem:[%s6253_s22 + $0x94] sm:$0xf0]  ;;  %v3651_v29 = vld [vmem:[%s6253_s22 + $0x188] sm:$0xf] }
 0x19e   : > { %2410 = vmatpush.bf16.msrb.mxu0 %v3472_v30  ;;  %v3924_v30 = vor.u32 %v4219_v16, %v3923_v15  ;;  %v4151_v32 = vld [vmem:[%s6253_s22 + $0x194] sm:$0xf0]  ;;  %v3779_v34 = vld [vmem:[%s6253_s22 + $0x288] sm:$0xf]  ;;  %2619 = vperm.xlu1 %4265, %v2616_v17   ;;  %v3524_v41 = vor.u32 %v4119_v24, %v3523_v22  ;;  %v4129_v24 = vld [vmem:[%s6253_s22 + $0xec] sm:$0xf] }
 0x19f   : > { %2423 = vmatpush.bf16.msrb.mxu1 %v3600_v37  ;;  %v4183_v35 = vld [vmem:[%s6253_s22 + $0x294] sm:$0xf0]  ;;  %v3907_v37 = vld [vmem:[%s6253_s22 + $0x388] sm:$0xf]  ;;  %v3652_v26 = vor.u32 %v4151_v32, %v3651_v29  ;;  %v3573_v29 = vld [vmem:[%s6253_s22 + $0xf8] sm:$0xf0] }
 0x1a0   : > { %2436 = vmatpush.bf16.msrb.mxu2 %v3728_v38  ;;  %v4215_v38 = vld [vmem:[%s6253_s22 + $0x394] sm:$0xf0]  ;;  %v3780_v42 = vor.u32 %v4183_v35, %v3779_v34  ;;  %v3635_v28 = vld [vmem:[%s6253_s22 + $0x168] sm:$0xf]  ;;  %v3701_v34 = vld [vmem:[%s6253_s22 + $0x1f8] sm:$0xf0] }
 0x1a1   : > { %2449 = vmatpush.bf16.msrb.mxu3 %v3856_v27  ;;  %v3507_v27 = vld [vmem:[%s6253_s22 + $0x68] sm:$0xf]  ;;  %v4115_v43 = vld [vmem:[%s6253_s22 + $0x74] sm:$0xf0]  ;;  %v3908_v44 = vor.u32 %v4215_v38, %v3907_v37  ;;  %v4193_v35 = vld [vmem:[%s6253_s22 + $0x2ec] sm:$0xf] }
 0x1a2   : > { %2411 = vmatpush.bf16.msrb.mxu0 %v3456_v48  ;;  %v4147_v45 = vld [vmem:[%s6253_s22 + $0x174] sm:$0xf0]  ;;  %v3763_v46 = vld [vmem:[%s6253_s22 + $0x268] sm:$0xf]  ;;  %v3508_v50 = vor.u32 %v4115_v43, %v3507_v27  ;;  %v3829_v37 = vld [vmem:[%s6253_s22 + $0x2f8] sm:$0xf0]  ;;  %v3576_v43 = vor.u32 %v4129_v24, %v3573_v29 }
 0x1a3   : > { %2424 = vmatpush.bf16.msrb.mxu1 %v3584_v52  ;;  %v4179_v47 = vld [vmem:[%s6253_s22 + $0x274] sm:$0xf0]  ;;  %v3891_v48 = vld [vmem:[%s6253_s22 + $0x368] sm:$0xf]  ;;  %v3636_v51 = vor.u32 %v4147_v45, %v3635_v28  ;;  %v4125_v45 = vld [vmem:[%s6253_s22 + $0xcc] sm:$0xf] }
 0x1a4   : > { %2437 = vmatpush.bf16.msrb.mxu2 %v3712_v53  ;;  %v4211_v49 = vld [vmem:[%s6253_s22 + $0x374] sm:$0xf0]  ;;  %v3764_v52 = vor.u32 %v4179_v47, %v3763_v46  ;;  %v3491_v53 = vld [vmem:[%s6253_s22 + $0x48] sm:$0xf]  ;;  %v3557_v46 = vld [vmem:[%s6253_s22 + $0xd8] sm:$0xf0] }
 0x1a5   : > { %2450 = vmatpush.bf16.msrb.mxu3 %v3840_v56  ;;  %2412 = vmatmul.bf16.vlgmr.msrb.gmra.mxu0 %v5535_v40  ;;  %v4111_v54 = vld [vmem:[%s6253_s22 + $0x54] sm:$0xf0]  ;;  %v3619_v55 = vld [vmem:[%s6253_s22 + $0x148] sm:$0xf]  ;;  %v3892_v56 = vor.u32 %v4211_v49, %v3891_v48  ;;  %v4157_v47 = vld [vmem:[%s6253_s22 + $0x1cc] sm:$0xf] }
 0x1a6   : > { %2456 = vmatpush.bf16.msra.mxu0 %v3572_v57  ;;  %2425 = vmatmul.bf16.vlgmr.msrb.gmra.mxu1 %v5539_v25  ;;  %v4143_v57 = vld [vmem:[%s6253_s22 + $0x154] sm:$0xf0]  ;;  %v3875_v60 = vld [vmem:[%s6253_s22 + $0x348] sm:$0xf]  ;;  %v3492_v62 = vor.u32 %v4111_v54, %v3491_v53  ;;  %v3685_v49 = vld [vmem:[%s6253_s22 + $0x1d8] sm:$0xf0]  ;;  %v3560_v54 = vor.u32 %v4125_v45, %v3557_v46 }
 0x1a7   : > { %2469 = vmatpush.bf16.msra.mxu1 %v3700_v58  ;;  %2438 = vmatmul.bf16.vlgmr.msrb.gmra.mxu2 %v5505_v23  ;;  %v3747_v58 = vld [vmem:[%s6253_s22 + $0x248] sm:$0xf]  ;;  %v4207_v61 = vld [vmem:[%s6253_s22 + $0x354] sm:$0xf0]  ;;  %v3941_v53 = vld [vmem:[%s6253_s22 + $0x3d8] sm:$0xf0] }
 0x1a8   : > { %2482 = vmatpush.bf16.msra.mxu2 %v3828_v59  ;;  %2451 = vmatmul.bf16.vlgmr.msrb.gmra.mxu3 %v5531_v39  ;;  %v4175_v59 = vld [vmem:[%s6253_s22 + $0x254] sm:$0xf0]  ;;  %v3475_v1 = vld [vmem:[%s6253_s22 + $0x28] sm:$0xf]  ;;  %v3876_v4 = vor.u32 %v4207_v61, %v3875_v60  ;;  %v3669_v61 = vld [vmem:[%s6253_s22 + $0x1b8] sm:$0xf0] }
 0x1a9   : > { %2495 = vmatpush.bf16.msra.mxu3 %v3956_v63  ;;  %v3620_v63 = vor.u32 %v4143_v57, %v3619_v55  ;;  %v3748_v0 = vor.u32 %v4175_v59, %v3747_v58  ;;  %v4107_v2 = vld [vmem:[%s6253_s22 + $0x34] sm:$0xf0]  ;;  %v3603_v3 = vld [vmem:[%s6253_s22 + $0x128] sm:$0xf]  ;;  %v3688_v55 = vor.u32 %v4157_v47, %v3685_v49  ;;  %v4121_v57 = vld [vmem:[%s6253_s22 + $0xac] sm:$0xf] }
 0x1aa   : > { %2457 = vmatpush.bf16.msra.mxu0 %v3556_v5  ;;  %v4139_v5 = vld [vmem:[%s6253_s22 + $0x134] sm:$0xf0]  ;;  %v3859_v8 = vld [vmem:[%s6253_s22 + $0x328] sm:$0xf]  ;;  %v3476_v10 = vor.u32 %v4107_v2, %v3475_v1  ;;  %v3541_v58 = vld [vmem:[%s6253_s22 + $0xb8] sm:$0xf0] }
 0x1ab   : > { %2470 = vmatpush.bf16.msra.mxu1 %v3684_v6  ;;  %v3731_v6 = vld [vmem:[%s6253_s22 + $0x228] sm:$0xf]  ;;  %v4203_v9 = vld [vmem:[%s6253_s22 + $0x334] sm:$0xf0]  ;;  %v3604_v13 = vor.u32 %v4139_v5, %v3603_v3  ;;  %v4153_v59 = vld [vmem:[%s6253_s22 + $0x1ac] sm:$0xf]  ;;  %v3544_v2 = vor.u32 %v4121_v57, %v3541_v58 }
 0x1ac   : > { %2483 = vmatpush.bf16.msra.mxu2 %v3812_v7  ;;  %v4171_v7 = vld [vmem:[%s6253_s22 + $0x234] sm:$0xf0]  ;;  %v3587_v15 = vld [vmem:[%s6253_s22 + $0x108] sm:$0xf]  ;;  %v3925_v1 = vld [vmem:[%s6253_s22 + $0x3b8] sm:$0xf0]  ;;  %v3672_v3 = vor.u32 %v4153_v59, %v3669_v61 }
 0x1ad   : > { %2496 = vmatpush.bf16.msra.mxu3 %v3940_v11  ;;  %v3459_v11 = vld [vmem:[%s6253_s22 + $0x8] sm:$0xf]  ;;  %v4103_v12 = vld [vmem:[%s6253_s22 + $0x14] sm:$0xf0]  ;;  %v3732_v14 = vor.u32 %v4171_v7, %v3731_v6  ;;  %v4117_v5 = vld [vmem:[%s6253_s22 + $0x8c] sm:$0xf] }
 0x1ae   : > { %2458 = vmatpush.bf16.msra.mxu0 %v3540_v19  ;;  %v4135_v16 = vld [vmem:[%s6253_s22 + $0x114] sm:$0xf0]  ;;  %v3715_v17 = vld [vmem:[%s6253_s22 + $0x208] sm:$0xf]  ;;  %v3860_v19 = vor.u32 %v4203_v9, %v3859_v8  ;;  %v3460_v32 = vor.u32 %v4103_v12, %v3459_v11  ;;  %v3525_v6 = vld [vmem:[%s6253_s22 + $0x98] sm:$0xf0] }
 0x1af   : > { %2471 = vmatpush.bf16.msra.mxu1 %v3668_v20  ;;  %v4167_v20 = vld [vmem:[%s6253_s22 + $0x214] sm:$0xf0]  ;;  %v3588_v38 = vor.u32 %v4135_v16, %v3587_v15  ;;  %v4149_v7 = vld [vmem:[%s6253_s22 + $0x18c] sm:$0xf]  ;;  %v3653_v9 = vld [vmem:[%s6253_s22 + $0x198] sm:$0xf0] }
 0x1b0   : > { %2484 = vmatpush.bf16.msra.mxu2 %v3796_v21  ;;  %v3843_v21 = vld [vmem:[%s6253_s22 + $0x308] sm:$0xf]  ;;  %v4199_v22 = vld [vmem:[%s6253_s22 + $0x314] sm:$0xf0]  ;;  %v3781_v11 = vld [vmem:[%s6253_s22 + $0x298] sm:$0xf0]  ;;  %v3656_v15 = vor.u32 %v4149_v7, %v3653_v9 }
 0x1b1   : > { %2497 = vmatpush.bf16.msra.mxu3 %v3924_v30  ;;  %v4161_v30 = vld [vmem:[%s6253_s22 + $0x1ec] sm:$0xf]  ;;  %v3844_v27 = vor.u32 %v4199_v22, %v3843_v21  ;;  %v3637_v22 = vld [vmem:[%s6253_s22 + $0x178] sm:$0xf0] }
 0x1b2   : > { %2459 = vmatpush.bf16.msra.mxu0 %v3524_v41  ;;  %v3716_v41 = vor.u32 %v4167_v20, %v3715_v17  ;;  %v3704_v28 = vor.u32 %v4161_v30, %v3701_v34  ;;  %v4213_v12 = vld [vmem:[%s6253_s22 + $0x38c] sm:$0xf]  ;;  %v3765_v29 = vld [vmem:[%s6253_s22 + $0x278] sm:$0xf0] }
 0x1b3   : > { %2472 = vmatpush.bf16.msra.mxu1 %v3652_v26  ;;  %v4225_v26 = vld [vmem:[%s6253_s22 + $0x3ec] sm:$0xf]  ;;  %v3877_v45 = vld [vmem:[%s6253_s22 + $0x358] sm:$0xf0] }
 0x1b4   : > { %2485 = vmatpush.bf16.msra.mxu2 %v3780_v42  ;;  %v3957_v42 = vld [vmem:[%s6253_s22 + $0x3f8] sm:$0xf0]  ;;  %v4113_v17 = vld [vmem:[%s6253_s22 + $0x6c] sm:$0xf] }
 0x1b5   : > { %2498 = vmatpush.bf16.msra.mxu3 %v3908_v44  ;;  %v3832_v44 = vor.u32 %v4193_v35, %v3829_v37  ;;  %v3960_v48 = vor.u32 %v4225_v26, %v3957_v42  ;;  %v4145_v20 = vld [vmem:[%s6253_s22 + $0x16c] sm:$0xf]  ;;  %v3861_v57 = vld [vmem:[%s6253_s22 + $0x338] sm:$0xf0] }
 0x1b6   : > { %2460 = vmatpush.bf16.msra.mxu0 %v3508_v50  ;;  %v4189_v50 = vld [vmem:[%s6253_s22 + $0x2cc] sm:$0xf]  ;;  %v3640_v35 = vor.u32 %v4145_v20, %v3637_v22 }
 0x1b7   : > { %2473 = vmatpush.bf16.msra.mxu1 %v3636_v51  ;;  %v3813_v51 = vld [vmem:[%s6253_s22 + $0x2d8] sm:$0xf0]  ;;  %v4177_v24 = vld [vmem:[%s6253_s22 + $0x26c] sm:$0xf] }
 0x1b8   : > { %2486 = vmatpush.bf16.msra.mxu2 %v3764_v52  ;;  %v4221_v52 = vld [vmem:[%s6253_s22 + $0x3cc] sm:$0xf]  ;;  %v3768_v37 = vor.u32 %v4177_v24, %v3765_v29 }
 0x1b9   : > { %2499 = vmatpush.bf16.msra.mxu3 %v3892_v56  ;;  %v3816_v56 = vor.u32 %v4189_v50, %v3813_v51  ;;  %v3944_v60 = vor.u32 %v4221_v52, %v3941_v53  ;;  %v4209_v30 = vld [vmem:[%s6253_s22 + $0x36c] sm:$0xf]  ;;  %v3477_v50 = vld [vmem:[%s6253_s22 + $0x38] sm:$0xf0] }
 0x1ba   : > { %2461 = vmatpush.bf16.msra.mxu0 %v3492_v62  ;;  %v4185_v62 = vld [vmem:[%s6253_s22 + $0x2ac] sm:$0xf]  ;;  %v3605_v53 = vld [vmem:[%s6253_s22 + $0x138] sm:$0xf0] }
 0x1bb   : > { %2474 = vmatpush.bf16.msra.mxu1 %v3620_v63  ;;  %v3797_v63 = vld [vmem:[%s6253_s22 + $0x2b8] sm:$0xf0]  ;;  %v4141_v26 = vld [vmem:[%s6253_s22 + $0x14c] sm:$0xf] }
 0x1bc   : > { %2487 = vmatpush.bf16.msra.mxu2 %v3748_v0  ;;  %v4217_v0 = vld [vmem:[%s6253_s22 + $0x3ac] sm:$0xf] }
 0x1bd   : > { %2500 = vmatpush.bf16.msra.mxu3 %v3876_v4  ;;  %v3800_v4 = vor.u32 %v4185_v62, %v3797_v63  ;;  %v3928_v8 = vor.u32 %v4217_v0, %v3925_v1  ;;  %v4105_v49 = vld [vmem:[%s6253_s22 + $0x2c] sm:$0xf]  ;;  %v3461_v62 = vld [vmem:[%s6253_s22 + $0x18] sm:$0xf0] }
 0x1be   : > { %2462 = vmatpush.bf16.msra.mxu0 %v3476_v10  ;;  %v4181_v10 = vld [vmem:[%s6253_s22 + $0x28c] sm:$0xf]  ;;  %v3480_v58 = vor.u32 %v4105_v49, %v3477_v50  ;;  %v3589_v1 = vld [vmem:[%s6253_s22 + $0x118] sm:$0xf0] }
 0x1bf   : > { %2475 = vmatpush.bf16.msra.mxu1 %v3604_v13  ;;  %v3909_v13 = vld [vmem:[%s6253_s22 + $0x398] sm:$0xf0]  ;;  %v3784_v16 = vor.u32 %v4181_v10, %v3781_v11  ;;  %v4137_v51 = vld [vmem:[%s6253_s22 + $0x12c] sm:$0xf] }
 0x1c0   : > { %2488 = vmatpush.bf16.msra.mxu2 %v3732_v14  ;;  %v3528_v14 = vor.u32 %v4117_v5, %v3525_v6  ;;  %v3912_v21 = vor.u32 %v4213_v12, %v3909_v13  ;;  %v3608_v59 = vor.u32 %v4137_v51, %v3605_v53  ;;  %v4101_v61 = vld [vmem:[%s6253_s22 + $0xc] sm:$0xf]  ;;  %v3845_v5 = vld [vmem:[%s6253_s22 + $0x318] sm:$0xf0] }
 0x1c1   : > { %2501 = vmatpush.bf16.msra.mxu3 %v3860_v19  ;;  %v3509_v19 = vld [vmem:[%s6253_s22 + $0x78] sm:$0xf0]  ;;  %v4133_v63 = vld [vmem:[%s6253_s22 + $0x10c] sm:$0xf]  ;;  %v3464_v6 = vor.u32 %v4101_v61, %v3461_v62 }
 0x1c2   : > { %2463 = vmatpush.bf16.msra.mxu0 %v3460_v32  ;;  %v3893_v32 = vld [vmem:[%s6253_s22 + $0x378] sm:$0xf0]  ;;  %v3512_v34 = vor.u32 %v4113_v17, %v3509_v19  ;;  %v3592_v7 = vor.u32 %v4133_v63, %v3589_v1 }
 0x1c3   : > { %2476 = vmatpush.bf16.msra.mxu1 %v3588_v38  ;;  %v4109_v38 = vld [vmem:[%s6253_s22 + $0x4c] sm:$0xf]  ;;  %v3896_v42 = vor.u32 %v4209_v30, %v3893_v32 }
 0x1c4   : > { %2489 = vmatpush.bf16.msra.mxu2 %v3716_v41  ;;  %v3493_v41 = vld [vmem:[%s6253_s22 + $0x58] sm:$0xf0] }
 0x1c5   : > { %2502 = vmatpush.bf16.msra.mxu3 %v3844_v27  ;;  %2464 = vmatmul.bf16.vlgmr.msra.gmra.mxu0 %v5535_v40  ;;  %v3621_v27 = vld [vmem:[%s6253_s22 + $0x158] sm:$0xf0]  ;;  %v3496_v46 = vor.u32 %v4109_v38, %v3493_v41 }
 0x1c6   : > { %2508 = vmatpush.bf16.msrb.mxu0 %v3576_v43  ;;  %2477 = vmatmul.bf16.vlgmr.msra.gmra.mxu1 %v5539_v25  ;;  %v4173_v43 = vld [vmem:[%s6253_s22 + $0x24c] sm:$0xf]  ;;  %v3624_v47 = vor.u32 %v4141_v26, %v3621_v27 }
 0x1c7   : > { %2521 = vmatpush.bf16.msrb.mxu1 %v3704_v28  ;;  %2490 = vmatmul.bf16.vlgmr.msra.gmra.mxu2 %v5505_v23  ;;  %v3749_v28 = vld [vmem:[%s6253_s22 + $0x258] sm:$0xf0] }
 0x1c8   : > { %2534 = vmatpush.bf16.msrb.mxu2 %v3832_v44  ;;  %2503 = vmatmul.bf16.vlgmr.msra.gmra.mxu3 %v5531_v39  ;;  %v4205_v44 = vld [vmem:[%s6253_s22 + $0x34c] sm:$0xf] }
 0x1c9   : > { %2547 = vmatpush.bf16.msrb.mxu3 %v3960_v48  ;;  %v3752_v48 = vor.u32 %v4173_v43, %v3749_v28  ;;  %v3880_v52 = vor.u32 %v4205_v44, %v3877_v45 }
 0x1ca   : > { %2509 = vmatpush.bf16.msrb.mxu0 %v3560_v54  ;;  %v4169_v54 = vld [vmem:[%s6253_s22 + $0x22c] sm:$0xf] }
 0x1cb   : > { %2522 = vmatpush.bf16.msrb.mxu1 %v3688_v55  ;;  %v3733_v55 = vld [vmem:[%s6253_s22 + $0x238] sm:$0xf0] }
 0x1cc   : > { %2535 = vmatpush.bf16.msrb.mxu2 %v3816_v56  ;;  %v4201_v56 = vld [vmem:[%s6253_s22 + $0x32c] sm:$0xf] }
 0x1cd   : > { %2548 = vmatpush.bf16.msrb.mxu3 %v3944_v60  ;;  %v3736_v60 = vor.u32 %v4169_v54, %v3733_v55  ;;  %v3864_v0 = vor.u32 %v4201_v56, %v3861_v57 }
 0x1ce   : > { %2510 = vmatpush.bf16.msrb.mxu0 %v3544_v2  ;;  %v4165_v2 = vld [vmem:[%s6253_s22 + $0x20c] sm:$0xf] }
 0x1cf   : > { %2523 = vmatpush.bf16.msrb.mxu1 %v3672_v3  ;;  %v3717_v3 = vld [vmem:[%s6253_s22 + $0x218] sm:$0xf0] }
 0x1d0   : > { %2536 = vmatpush.bf16.msrb.mxu2 %v3800_v4  ;;  %v4197_v4 = vld [vmem:[%s6253_s22 + $0x30c] sm:$0xf] }
 0x1d1   : > { %2549 = vmatpush.bf16.msrb.mxu3 %v3928_v8  ;;  %v3720_v8 = vor.u32 %v4165_v2, %v3717_v3  ;;  %v3848_v9 = vor.u32 %v4197_v4, %v3845_v5 }
 0x1d2   : > { %2511 = vmatpush.bf16.msrb.mxu0 %v3528_v14 }
 0x1d3   : > { %2524 = vmatpush.bf16.msrb.mxu1 %v3656_v15 }
 0x1d4   : > { %2537 = vmatpush.bf16.msrb.mxu2 %v3784_v16 }
 0x1d5   : > { %2550 = vmatpush.bf16.msrb.mxu3 %v3912_v21 }
 0x1d6   : > { %2512 = vmatpush.bf16.msrb.mxu0 %v3512_v34 }
 0x1d7   : > { %2525 = vmatpush.bf16.msrb.mxu1 %v3640_v35 }
 0x1d8   : > { %2538 = vmatpush.bf16.msrb.mxu2 %v3768_v37 }
 0x1d9   : > { %2551 = vmatpush.bf16.msrb.mxu3 %v3896_v42 }
 0x1da   : > { %2513 = vmatpush.bf16.msrb.mxu0 %v3496_v46 }
 0x1db   : > { %2526 = vmatpush.bf16.msrb.mxu1 %v3624_v47 }
 0x1dc   : > { %2539 = vmatpush.bf16.msrb.mxu2 %v3752_v48 }
 0x1dd   : > { %2552 = vmatpush.bf16.msrb.mxu3 %v3880_v52 }
 0x1de   : > { %2514 = vmatpush.bf16.msrb.mxu0 %v3480_v58 }
 0x1df   : > { %2527 = vmatpush.bf16.msrb.mxu1 %v3608_v59 }
 0x1e0   : > { %2540 = vmatpush.bf16.msrb.mxu2 %v3736_v60 }
 0x1e1   : > { %2553 = vmatpush.bf16.msrb.mxu3 %v3864_v0 }
 0x1e2   : > { %2515 = vmatpush.bf16.msrb.mxu0 %v3464_v6 }
 0x1e3   : > { %2528 = vmatpush.bf16.msrb.mxu1 %v3592_v7 }
 0x1e4   : > { %2541 = vmatpush.bf16.msrb.mxu2 %v3720_v8 }
 0x1e5   : > { %2554 = vmatpush.bf16.msrb.mxu3 %v3848_v9  ;;  %2516 = vmatmul.bf16.vlgmr.msrb.gmra.mxu0 %v5535_v40 }
 0x1e6   : > { %2529 = vmatmul.bf16.vlgmr.msrb.gmra.mxu1 %v5539_v25 }
 0x1e7   : > { %2542 = vmatmul.bf16.vlgmr.msrb.gmra.mxu2 %v5505_v23 }
 0x1e8   : > { %2555 = vmatmul.bf16.vlgmr.msrb.gmra.mxu3 %v5531_v39 }
 0x204   : > { %v2572_v26 = vpop.permute.xlu0 %2571 }
 0x205   : > { %v2361_v10 = vpop.f32.mrf.mxu0 }
 0x206   : > { %v2374_v11 = vpop.f32.mrf.mxu1 }
 0x207   : > { %v2375_v12 = vadd.f32 %v2374_v11, %v2361_v10 }
 0x20a   : > { %v2387_v13 = vpop.f32.mrf.mxu2 }
 0x20b   : > { %v2388_v14 = vadd.f32 %v2387_v13, %v2375_v12 }
 0x20d   : > { %v2400_v15 = vpop.f32.mrf.mxu3  ;;  %v2363_v17 = vpop.f32.mrf.mxu0 }
 0x20e   : > { %v2401_v16 = vadd.f32 %v2400_v15, %v2388_v14  ;;  %v2376_v19 = vpop.f32.mrf.mxu1  ;;  %v2582_v48 = vpop.permute.xlu0 %2581 }
 0x20f   : > { %v2585_v49 = vmul.f32 %v2582_v48, %v5521_v36  ;;  %v2586_v51 = vmul.f32 %v2582_v48, %v5492_v18  ;;  %v2584_v55 = vmul.f32 %v2582_v48, %v5519_v33  ;;  %v2587_v33 = vmul.f32 %v2582_v48, %v5517_v31 }
 0x210   : > { %v2574_v54 = vmul.f32 %v2572_v26, %v2401_v16 }
 0x212   : > { %v2389_v20 = vpop.f32.mrf.mxu2  ;;  %v2588_v60 = vadd.f32 %v2584_v55, %v2574_v54 }
 0x214   : > { %v2592_v0 = vrot.slane %v2588_v60, 4 }
 0x215   : > { %v2402_v21 = vpop.f32.mrf.mxu3 }
 0x216   : > { %v2593_v6 = vadd.f32 %v2592_v0, %v2588_v60 }
 0x218   : > { %v2594_v11 = vrot.slane %v2593_v6, 2 }
 0x21a   : > { %v2595_v19 = vadd.f32 %v2594_v11, %v2593_v6 }
 0x222   : > { %v2413_v22 = vpop.f32.mrf.mxu0 }
 0x223   : > { %v2426_v24 = vpop.f32.mrf.mxu1 }
 0x224   : > { %v2427_v38 = vadd.f32 %v2426_v24, %v2413_v22  ;;  %v2620_v22 = vpop.permute.xlu1 %2619 }
 0x22a   : > { %v2439_v40 = vpop.f32.mrf.mxu2  ;;  %v2415_v25 = vpop.f32.mrf.mxu0 }
 0x22b   : > { %v2452_v29 = vpop.f32.mrf.mxu3  ;;  %v2428_v30 = vpop.f32.mrf.mxu1  ;;  %v2440_v43 = vadd.f32 %v2439_v40, %v2427_v38  ;;  %v2622_v25 = vperm.slane %v2620_v22, 0 }
 0x22d   : > { %v2453_v46 = vadd.f32 %v2452_v29, %v2440_v43  ;;  %v2596_v29 = vrot.slane %v2595_v19, 1 }
 0x22f   : > { %v2575_v50 = vmul.f32 %v2572_v26, %v2453_v46 }
 0x231   : > { %v2589_v53 = vadd.f32 %v2585_v49, %v2575_v50 }
 0x232   : > { %v2441_v23 = vpop.f32.mrf.mxu2 }
 0x233   : > { %v2454_v32 = vpop.f32.mrf.mxu3  ;;  %v2598_v57 = vrot.slane %v2589_v53, 4 }
 0x235   : > { %v2599_v62 = vadd.f32 %v2598_v57, %v2589_v53 }
 0x237   : > { %v2600_v36 = vrot.slane %v2599_v62, 2 }
 0x239   : > { %v2601_v9 = vadd.f32 %v2600_v36, %v2599_v62 }
 0x23b   : > { %v2602_v15 = vrot.slane %v2601_v9, 1 }
 0x23d   : > { %v2603_v24 = vadd.f32 %v2602_v15, %v2601_v9 }
 0x23f   : > { %v2624_v31 = vadd.f32 %v2622_v25, %v2603_v24 }
 0x241   : > { %v2631_v38 = vrot.slane %v2624_v31, 7 }
 0x242   : > { %v2465_v39 = vpop.f32.mrf.mxu0 }
 0x243   : > { %v2478_v34 = vpop.f32.mrf.mxu1 }
 0x244   : > { %v2479_v27 = vadd.f32 %v2478_v34, %v2465_v39  ;;  %v2597_v39 = vadd.f32 %v2596_v29, %v2595_v19 }
 0x24a   : > { %v2491_v35 = vpop.f32.mrf.mxu2  ;;  %v2467_v41 = vpop.f32.mrf.mxu0 }
 0x24b   : > { %v2504_v37 = vpop.f32.mrf.mxu3  ;;  %v2480_v42 = vpop.f32.mrf.mxu1  ;;  %v2492_v44 = vadd.f32 %v2491_v35, %v2479_v27 }
 0x24d   : > { %v2505_v47 = vadd.f32 %v2504_v37, %v2492_v44  ;;  %v2642_v37 = vlaneseq }
 0x24f   : > { %v2576_v52 = vmul.f32 %v2572_v26, %v2505_v47  ;;  %vm2644_vm3 = vcmp.lt.s32.totalorder %v2642_v37, 512 }
 0x251   : > { %v2590_v56 = vadd.f32 %v2586_v51, %v2576_v52 }
 0x252   : > { %v2493_v28 = vpop.f32.mrf.mxu2 }
 0x253   : > { %v2506_v45 = vpop.f32.mrf.mxu3  ;;  %v2604_v61 = vrot.slane %v2590_v56, 4 }
 0x255   : > { %v2605_v1 = vadd.f32 %v2604_v61, %v2590_v56 }
 0x257   : > { %v2606_v7 = vrot.slane %v2605_v1, 2 }
 0x259   : > { %v2607_v12 = vadd.f32 %v2606_v7, %v2605_v1 }
 0x25b   : > { %v2608_v20 = vrot.slane %v2607_v12, 1 }
 0x25d   : > { %v2609_v30 = vadd.f32 %v2608_v20, %v2607_v12 }
 0x25f   : > { %v2625_v34 = vadd.f32 %v2622_v25, %v2609_v30 }
 0x261   : > { %v2632_v42 = vrot.slane %v2625_v34, 6 }
 0x262   : > { %v2517_v58 = vpop.f32.mrf.mxu0 }
 0x263   : > { %v2530_v59 = vpop.f32.mrf.mxu1 }
 0x264   : > { %v2531_v63 = vadd.f32 %v2530_v59, %v2517_v58 }
 0x26a   : > { %v2543_v2 = vpop.f32.mrf.mxu2  ;;  %v2519_v18 = vpop.f32.mrf.mxu0 }
 0x26b   : > { %v2544_v3 = vadd.f32 %v2543_v2, %v2531_v63  ;;  %v2556_v4 = vpop.f32.mrf.mxu3  ;;  %v2532_v5 = vpop.f32.mrf.mxu1 }
 0x26d   : > { %v2557_v8 = vadd.f32 %v2556_v4, %v2544_v3 }
 0x26f   : > { %v2577_v10 = vmul.f32 %v2572_v26, %v2557_v8  ;;  %v2623_v26 = vadd.f32 %v2622_v25, %v2597_v39 }
 0x271   : > { %v2591_v13 = vadd.f32 %v2587_v33, %v2577_v10  ;;  %v2635_v43 = vsel %vm2634_vm0, %v2623_v26, %v2631_v38 }
 0x272   : > { %v2545_v14 = vpop.f32.mrf.mxu2 }
 0x273   : > { %v2610_v16 = vrot.slane %v2591_v13, 4  ;;  %v2558_v17 = vpop.f32.mrf.mxu3 }
 0x275   : > { %v2611_v21 = vadd.f32 %v2610_v16, %v2591_v13 }
 0x277   : > { %v2612_v40 = vrot.slane %v2611_v21, 2 }
 0x279   : > { %v2613_v23 = vadd.f32 %v2612_v40, %v2611_v21 }
 0x27b   : > { %v2614_v32 = vrot.slane %v2613_v23, 1 }
 0x27d   : > { %v2615_v35 = vadd.f32 %v2614_v32, %v2613_v23 }
 0x27f   : > { %v2626_v41 = vadd.f32 %v2622_v25, %v2615_v35 }
 0x281   : > { %v2633_v27 = vrot.slane %v2626_v41, 5 }
 0x283   : > { %v2637_v28 = vsel %vm2636_vm1, %v2632_v42, %v2633_v27 }
 0x284   : > { %v2639_v44 = vsel %vm2638_vm2, %v2635_v43, %v2637_v28 }
 0x285   : > { %2646 = vst.msk [vmem:[#allocation3] sm:$0xf] %vm2644_vm3, %v2639_v44 }
 0x286 PF: > { %2651 = sbr.rel (!%p1572_p5) target bundleno = 1473 (0x5c1), region = 96  ;;  %v2677_v45 = vld [vmem:[%s6238_s8 + $0x78] sm:$0xff] (%p1572_p5)  ;;  %v2676_v46 = vld [vmem:[%s6238_s8 + $0x70] sm:$0xff] (%p1572_p5)  ;;  %v2675_v49 = vld [vmem:[%s6238_s8 + $0x68] sm:$0xff] (%p1572_p5)  ;;  %v2653_v53 = vlaneseq (%p1572_p5)  ;;  %vm2760_vm5 = vcmask (%p1572_p5), 1041408   ;;  %vm2756_vm6 = vcmask (%p1572_p5), 408576  }
 0x287   : > { %v2693_v47 = vld [vmem:[%s6238_s8 + $0xf8] sm:$0xff] (%p1572_p5)  ;;  %2704 = vmatpush.msra.mxu0 (%p1572_p5), %v2677_v45  ;;  %v2692_v48 = vld [vmem:[%s6238_s8 + $0xf0] sm:$0xff] (%p1572_p5)  ;;  %v2691_v50 = vld [vmem:[%s6238_s8 + $0xe8] sm:$0xff] (%p1572_p5)  ;;  %vm2791_vm7 = vcmask (%p1572_p5), 80896   ;;  %vm2824_vm8 = vcmask (%p1572_p5), 15360   ;;  %vm2851_vm9 = vcmask (%p1572_p5), 25600  }
 0x288   : > { %2724 = vmatpush.msra.mxu1 (%p1572_p5), %v2693_v47  ;;  %v2674_v51 = vld [vmem:[%s6238_s8 + $0x60] sm:$0xff] (%p1572_p5)  ;;  %v2673_v54 = vld [vmem:[%s6238_s8 + $0x58] sm:$0xff] (%p1572_p5)  ;;  %v2672_v56 = vld [vmem:[%s6238_s8 + $0x50] sm:$0xff] (%p1572_p5)  ;;  %vm2655_vm4 = vcmp.lt.s32.totalorder (%p1572_p5), %v2653_v53, 256 }
 0x289   : > { %2705 = vmatpush.msra.mxu0 (%p1572_p5), %v2676_v46  ;;  %v2690_v52 = vld [vmem:[%s6238_s8 + $0xe0] sm:$0xff] (%p1572_p5)  ;;  %v2689_v55 = vld [vmem:[%s6238_s8 + $0xd8] sm:$0xff] (%p1572_p5)  ;;  %v2688_v57 = vld [vmem:[%s6238_s8 + $0xd0] sm:$0xff] (%p1572_p5) }
 0x28a   : > { %2725 = vmatpush.msra.mxu1 (%p1572_p5), %v2692_v48  ;;  %v2671_v58 = vld [vmem:[%s6238_s8 + $0x48] sm:$0xff] (%p1572_p5)  ;;  %v2670_v62 = vld [vmem:[%s6238_s8 + $0x40] sm:$0xff] (%p1572_p5)  ;;  %v2751_v63 = vld [vmem:[%s6240_s10 + $0x30] sm:$0x3] (%p1572_p5) }
 0x28b   : > { %2706 = vmatpush.msra.mxu0 %v2675_v49  ;;  %v2687_v59 = vld [vmem:[%s6238_s8 + $0xc8] sm:$0xff]  ;;  %v2669_v0 = vld [vmem:[%s6238_s8 + $0x38] sm:$0xff]  ;;  %v2686_v1 = vld [vmem:[%s6238_s8 + $0xc0] sm:$0xff]  ;;  %3962 = vmatpush.msk.msra.mxu2 %vm2760_vm5, %v2751_v63 }
 0x28c   : > { %2726 = vmatpush.msra.mxu1 %v2691_v50  ;;  %v2652_v60 = vld [vmem:[#allocation3] sm:$0x3]  ;;  %v2658_v61 = vld [vmem:[#allocation3 + $0x2] sm:$0x3]  ;;  %v2749_v36 = vld [vmem:[%s6240_s10 + $0x20] sm:$0xff] }
 0x28d   : > { %2707 = vmatpush.msra.mxu0 %v2674_v51  ;;  %2657 = vst.msk [vmem:[#allocation4] ss:$2 sm:$0x3] %vm2655_vm4, %v2652_v60  ;;  %v2750_v2 = vld [vmem:[%s6240_s10 + $0x28] sm:$0xff]  ;;  %v2685_v3 = vld [vmem:[%s6238_s8 + $0xb8] sm:$0xff]  ;;  %v2668_v4 = vld [vmem:[%s6238_s8 + $0x30] sm:$0xff] }
 0x28e   : > { %2727 = vmatpush.msra.mxu1 %v2690_v52  ;;  %2660 = vst.msk [vmem:[#allocation4 + $0x1] ss:$2 sm:$0x3] %vm2655_vm4, %v2658_v61  ;;  %2774 = vmatpush.msra.mxu2 %v2750_v2  ;;  %v2684_v18 = vld [vmem:[%s6238_s8 + $0xb0] sm:$0xff]  ;;  %v2667_v5 = vld [vmem:[%s6238_s8 + $0x28] sm:$0xff]  ;;  %v2666_v8 = vld [vmem:[%s6238_s8 + $0x20] sm:$0xff] }
 0x28f   : > { %2708 = vmatpush.msra.mxu0 %v2673_v54  ;;  %v2683_v6 = vld [vmem:[%s6238_s8 + $0xa8] sm:$0xff]  ;;  %v2682_v33 = vld [vmem:[%s6238_s8 + $0xa0] sm:$0xff]  ;;  %v2665_v9 = vld [vmem:[%s6238_s8 + $0x18] sm:$0xff] }
 0x290   : > { %2728 = vmatpush.msra.mxu1 %v2689_v55  ;;  %2775 = vmatpush.msra.mxu2 %v2749_v36  ;;  %v2681_v10 = vld [vmem:[%s6238_s8 + $0x98] sm:$0xff]  ;;  %v2664_v11 = vld [vmem:[%s6238_s8 + $0x10] sm:$0xff]  ;;  %v2663_v13 = vld [vmem:[%s6238_s8 + $0x8] sm:$0xff] }
 0x291   : > { %2709 = vmatpush.msra.mxu0 %v2672_v56  ;;  %v2680_v12 = vld [vmem:[%s6238_s8 + $0x90] sm:$0xff]  ;;  %v2679_v14 = vld [vmem:[%s6238_s8 + $0x88] sm:$0xff]  ;;  %v2662_v15 = vld [vmem:[%s6238_s8] sm:$0xff] }
 0x292   : > { %2729 = vmatpush.msra.mxu1 %v2688_v57  ;;  %v2678_v16 = vld [vmem:[%s6238_s8 + $0x80] sm:$0xff]  ;;  %v2748_v20 = vld [vmem:[%s6240_s10 + $0x18] sm:$0xff]  ;;  %v2747_v21 = vld [vmem:[%s6240_s10 + $0x10] sm:$0xff] }
 0x293   : > { %2710 = vmatpush.msra.mxu0 %v2671_v58  ;;  %2776 = vmatpush.msra.mxu2 %v2748_v20  ;;  %v2746_v22 = vld [vmem:[%s6240_s10 + $0x8] sm:$0xff]  ;;  %v2745_v24 = vld [vmem:[%s6240_s10] sm:$0xff] }
 0x294   : > { %2730 = vmatpush.msra.mxu1 %v2687_v59  ;;  %v4266_v40 = vld [vmem:[%s6239_s9] ss:$0 sm:$0xff]  ;;  %v2786_v32 = vld [vmem:[%s6242_s12 + $0x8] sm:$0x3] }
 0x295   : > { %2711 = vmatpush.msra.mxu0 %v2670_v62  ;;  %v2661_v7 = vld [vmem:[#allocation4] sm:$0xf]  ;;  %2777 = vmatpush.msra.mxu2 %v2747_v21  ;;  %v2785_v39 = vld [vmem:[%s6242_s12] sm:$0xff] }
 0x296   : > { %2731 = vmatpush.msra.mxu1 %v2686_v1  ;;  %2699 = vst [vmem:[#allocation1] ss:$4 sm:$0xff] %v2661_v7  ;;  %3964 = vmatpush.msk.msra.mxu3 %vm2760_vm5, %v2786_v32  ;;  %v2819_v34 = vld [vmem:[%s6244_s14] sm:$0x3] }
 0x297   : > { %2712 = vmatpush.msra.mxu0 %v2669_v0  ;;  %2778 = vmatpush.msra.mxu2 %v2746_v22  ;;  %v4267_v35 = vld [vmem:[%s6241_s11] ss:$0 sm:$0xff] }
 0x298   : > { %2732 = vmatpush.msra.mxu1 %v2685_v3  ;;  %2813 = vmatpush.msra.mxu3 %v2785_v39  ;;  %v4268_v26 = vld [vmem:[%s6243_s13] ss:$0 sm:$0xff] }
 0x299   : > { %2713 = vmatpush.msra.mxu0 %v2668_v4  ;;  %2779 = vmatpush.msra.mxu2 %v2745_v24  ;;  %v4269_v28 = vld [vmem:[%s6245_s15] ss:$0 sm:$0xff] }
 0x29a   : > { %2733 = vmatpush.msra.mxu1 %v2684_v18  ;;  %3966 = vmatpush.msk.msrb.mxu3 %vm2760_vm5, %v2819_v34 }
 0x29b   : > { %2714 = vmatpush.msra.mxu0 %v2667_v5 }
 0x29c   : > { %2734 = vmatpush.msra.mxu1 %v2683_v6 }
 0x29d   : > { %2715 = vmatpush.msra.mxu0 %v2666_v8  ;;  %v2700_v17 = vld.sshfl [vmem:[#allocation1] sm:$0xff pattern:$0x73625140]  ;;  %v2701_v19 = vld.sshfl [vmem:[#allocation1 + $0x8] sm:$0xff pattern:$0x73625140] }
 0x29e   : > { %2735 = vmatpush.msra.mxu1 %v2682_v33 }
 0x29f   : > { %2716 = vmatpush.msra.mxu0 %v2665_v9 }
 0x2a0   : > { %2736 = vmatpush.msra.mxu1 %v2681_v10 }
 0x2a1   : > { %2717 = vmatpush.msra.mxu0 %v2664_v11 }
 0x2a2   : > { %2737 = vmatpush.msra.mxu1 %v2680_v12 }
 0x2a3   : > { %2718 = vmatpush.msra.mxu0 %v2663_v13 }
 0x2a4   : > { %2738 = vmatpush.msra.mxu1 %v2679_v14 }
 0x2a5   : > { %2719 = vmatpush.msra.mxu0 %v2662_v15 }
 0x2a6   : > { %2739 = vmatpush.msra.mxu1 %v2678_v16  ;;  %2720 = vmatmul.f32.vlgmr.msra.gmra.mxu0 %v2700_v17 }
 0x2a7   : > { %2740 = vmatmul.f32.vlgmr.msra.gmra.mxu1 %v2701_v19 }
 0x323   : > { %v2721_v29 = vpop.f32.mrf.mxu0 }
 0x324   : > { %v2741_v25 = vpop.f32.mrf.mxu1  ;;  %v2722_v30 = vadd.f32 %v4266_v40, %v2721_v29 }
 0x326   : > { %v2742_v23 = vadd.f32 %v2741_v25, %v2722_v30 }
 0x328   : > { %v2744_v31 = vmax.f32 %v2742_v23, 0.0 }
 0x32a   : > { %3963 = vmatmul.msk.f32.vlgmr.msra.gmra.mxu2 %vm2756_vm6, %v2744_v31 }
 0x3ad   : > { %v2781_v37 = vpop.f32.mrf.mxu2 }
 0x3ae   : > { %v2782_v38 = vadd.f32 %v4267_v35, %v2781_v37 }
 0x3b0   : > { %v2784_v41 = vmax.f32 %v2782_v38, 0.0 }
 0x3b2   : > { %3965 = vmatmul.msk.f32.vlgmr.msra.gmra.mxu3 %vm2791_vm7, %v2784_v41 }
 0x435   : > { %v2815_v42 = vpop.f32.mrf.mxu3 }
 0x436   : > { %v2816_v27 = vadd.f32 %v4268_v26, %v2815_v42 }
 0x438   : > { %v2818_v43 = vmax.f32 %v2816_v27, 0.0 }
 0x43a   : > { %3967 = vmatmul.msk.f32.vlgmr.msrb.gmra.mxu3 %vm2824_vm8, %v2818_v43 }
 0x4bd   : > { %v2848_v44 = vpop.f32.mrf.mxu3 }
 0x4be   : > { %v2849_v45 = vadd.f32 %v4269_v28, %v2848_v44 }
 0x4c0   : > { %v2852_v46 = vsel %vm2851_vm9, %v2849_v45, -inf }
 0x4c1   : > { %2853 = vmax.xlane.f32.xlu0 %v2852_v46 }
 0x534   : > { %v2854_v47 = vpop.xlane.xlu0 %2853 }
 0x535   : > { %v2855_v48 = vsub.f32 %v2849_v45, %v2854_v47 }
 0x537   : > { %v2856_v49 = vmul.f32 1.442695, %v2855_v48 }
 0x539   : > { %4270 = vpow2.f32 %v2856_v49 }
 0x53f   : > { %v4271_v50 = vpop.eup %4270 }
 0x540   : > { %v2858_v51 = vsel %vm2851_vm9, %v4271_v50, 0.0 }
 0x541   : > { %2859 = vadd.xlane.f32.xlu0 %v2858_v51 }
 0x5b4   : > { %v2860_v52 = vpop.xlane.xlu0 %2859 }
 0x5b5   : > { %4272 = vlog2.f32 %v2860_v52 }
 0x5bb   : > { %v4273_v53 = vpop.eup %4272 }
 0x5bc   : > { %v2862_v54 = vmul.f32 0.6931472, %v4273_v53 }
 0x5be   : > { %v2863_v55 = vsub.f32 %v2855_v48, %v2862_v54 }
 0x5c0   : > { %2864 = vst.msk [vmem:[#allocation6] sm:$0x3] %vm2851_vm9, %v2863_v55 }
 0x5c1 PF: > { %s6254_s23 = sadd.s32 4294967295, %s4328_s25   ;;  %s2873_s20 = sshll.u32 %s6246_s16, 4  ;;  %s2874_s20 = int_to_ptr.hbm [resolvable:$true] %s2873_s20 }
 0x5c2   : > { %p4233_p7 = scmp.eq.s32.totalorder %s6254_s23, 1  ;;  %s4332_s0 = smov [#allocation6]  }
 0x5c3   : > { %s2871_s21 = sshll.u32 %s4332_s0, 4  ;;  %s2872_s21 = int_to_ptr.vmem [resolvable:$true] %s2871_s21 }
 0x5c4   : > { %4230 = dma.vmem_to_hbm [thread:$0]  (%p4233_p7), %s2872_s21, 32, %s2874_s20, [#allocation7]  }
 0x5c5   : > { %4315 = dma.done.wait (%p4233_p7), [#allocation7], 32  }
 0x5c6   : > { %4317 = vsyncadd (%p4233_p7), [#allocation7], 4294967264 }
 0x5c7 PF: > { %s29_s25 = sadd.s32 1, %s4328_s25   ;;  %s6255_s23 = smov %s4324_s24 }
 0x5c8   : > { %p26_p8 = scmp.ge.s32.totalorder %s29_s25, 4   ;;  %s6256_s24 = smov %s6258_s26 }
 0x5ca   :  { %28 = sbr.rel (!%p26_p8) target bundleno = 5 (0x5), region = 128 }
 0x5cf   :  { %2887 = vsyncpa [#allocation7], 1 }
 0x5d0   :  { %2889 = vsyncpa [#allocation7 + $0x1], 1 }

</bundles_post_ra>
